<compile_context>
chip_gen: v5e
topology: v5e:2x2
jax: 0.10.0
libtpu: 0.0.40
codegen_flags: <defaults>
</compile_context>

<pallas_src>
import functools

import jax
import jax.numpy as jnp
from jax import lax
from jax.experimental import pallas as pl
from jax.experimental.pallas import tpu as pltpu

_VMEM_LIMIT = 48 * 1024 * 1024   # fits v7x (64 MiB physical) with headroom
_TILE_M_MAX = 512                # 512-row tiles ~= 85% of HBM roofline
_EPS = 1e-5


def _round_up(x, m):
    return (x + m - 1) // m * m


def _choose_tile_m(m):
    # multiple of 16 so bf16 sublane packing is clean; full extent if small.
    return min(_TILE_M_MAX, _round_up(m, 16))


# ----------------------------- Pallas kernels -----------------------------

def _deconv_mm_stats_kernel(p_ref, w_ref, y_ref, s_ref, q_ref):
    """Phase matmul (bf16 x bf16 -> f32 acc) + per-tile partial BN stats."""
    y = jnp.dot(p_ref[0], w_ref[0], preferred_element_type=jnp.float32)
    y_ref[0] = y
    c = y.shape[1]
    s = jnp.sum(y, axis=0, keepdims=True)           # (1, C)
    q = jnp.sum(y * y, axis=0, keepdims=True)       # (1, C)
    # Stats blocks are (8, C) for sublane alignment; row 0 carries the value.
    s_ref[0, 0] = jnp.broadcast_to(s, (8, c))
    q_ref[0, 0] = jnp.broadcast_to(q, (8, c))


def _bn_prelu_kernel(y_ref, scale_ref, shift_ref, alpha_ref, o_ref):
    """Fused BatchNorm apply (precomputed per-channel scale/shift) + PReLU."""
    z = y_ref[...] * scale_ref[...] + shift_ref[...]
    o_ref[...] = jnp.maximum(z, 0.0) + alpha_ref[...] * jnp.minimum(z, 0.0)


def _deconv_sigmoid_kernel(p_ref, w_ref, o_ref):
    """Phase matmul + sigmoid (final layer, lane-dense padded C_out)."""
    y = jnp.dot(p_ref[0], w_ref[0], preferred_element_type=jnp.float32)
    o_ref[0] = jax.nn.sigmoid(y)


# ------------------------- pallas_call wrappers ----------------------------

def _run_deconv_mm_stats(patches, wmats, tile_m):
    n_phase, m_pad, k = patches.shape
    c_out = wmats.shape[-1]
    n_tiles = m_pad // tile_m
    return pl.pallas_call(
        _deconv_mm_stats_kernel,
        out_shape=(
            jax.ShapeDtypeStruct((n_phase, m_pad, c_out), jnp.float32),
            jax.ShapeDtypeStruct((n_phase, n_tiles, 8, c_out), jnp.float32),
            jax.ShapeDtypeStruct((n_phase, n_tiles, 8, c_out), jnp.float32),
        ),
        grid_spec=pltpu.PrefetchScalarGridSpec(
            num_scalar_prefetch=0,
            grid=(n_phase, n_tiles),
            in_specs=[
                pl.BlockSpec((1, tile_m, k), lambda p, i: (p, i, 0)),
                pl.BlockSpec((1, k, c_out), lambda p, i: (p, 0, 0)),
            ],
            out_specs=[
                pl.BlockSpec((1, tile_m, c_out), lambda p, i: (p, i, 0)),
                pl.BlockSpec((1, 1, 8, c_out), lambda p, i: (p, i, 0, 0)),
                pl.BlockSpec((1, 1, 8, c_out), lambda p, i: (p, i, 0, 0)),
            ],
        ),
        compiler_params=pltpu.CompilerParams(
            dimension_semantics=("parallel", "parallel"),
            vmem_limit_bytes=_VMEM_LIMIT),
    )(patches, wmats)


def _run_bn_prelu(y_flat, scale, shift, alpha_row, tile_r):
    r, c = y_flat.shape
    n_tiles = r // tile_r
    return pl.pallas_call(
        _bn_prelu_kernel,
        out_shape=jax.ShapeDtypeStruct((r, c), jnp.float32),
        grid_spec=pltpu.PrefetchScalarGridSpec(
            num_scalar_prefetch=0,
            grid=(n_tiles,),
            in_specs=[
                pl.BlockSpec((tile_r, c), lambda i: (i, 0)),
                pl.BlockSpec((1, c), lambda i: (0, 0)),
                pl.BlockSpec((1, c), lambda i: (0, 0)),
                pl.BlockSpec((1, c), lambda i: (0, 0)),
            ],
            out_specs=pl.BlockSpec((tile_r, c), lambda i: (i, 0)),
        ),
        compiler_params=pltpu.CompilerParams(
            dimension_semantics=("parallel",),
            vmem_limit_bytes=_VMEM_LIMIT),
    )(y_flat, scale, shift, alpha_row)


def _run_deconv_sigmoid(patches, wmats, tile_m):
    n_phase, m_pad, k = patches.shape
    c_pad = wmats.shape[-1]
    n_tiles = m_pad // tile_m
    return pl.pallas_call(
        _deconv_sigmoid_kernel,
        out_shape=jax.ShapeDtypeStruct((n_phase, m_pad, c_pad), jnp.float32),
        grid_spec=pltpu.PrefetchScalarGridSpec(
            num_scalar_prefetch=0,
            grid=(n_phase, n_tiles),
            in_specs=[
                pl.BlockSpec((1, tile_m, k), lambda p, i: (p, i, 0)),
                pl.BlockSpec((1, k, c_pad), lambda p, i: (p, 0, 0)),
            ],
            out_specs=pl.BlockSpec((1, tile_m, c_pad), lambda p, i: (p, i, 0)),
        ),
        compiler_params=pltpu.CompilerParams(
            dimension_semantics=("parallel", "parallel"),
            vmem_limit_bytes=_VMEM_LIMIT),
    )(patches, wmats)


# --------------------- 4-phase deconv layout plumbing ----------------------

def _phase_patches(x_nhwc):
    """4-output-phase im2col for ConvTranspose2d(k=4, s=2, p=1).

    Returns (4, N*H*W, 4*C); phase p = 2*(oy%2) + (ox%2).  Each phase is a
    stride-1 2x2 conv over the 1-padded input, so only real (non-zero-
    inserted) input samples are gathered — no structural zeros.
    """
    n, h, w, c = x_nhwc.shape
    xp = jnp.pad(x_nhwc, ((0, 0), (1, 1), (1, 1), (0, 0)))
    phases = []
    for py in range(2):
        for px in range(2):
            taps = [xp[:, py + dy:py + dy + h, px + dx:px + dx + w, :]
                    for dy in range(2) for dx in range(2)]
            ph = jnp.concatenate(taps, axis=-1)          # (N, H, W, 4*C)
            phases.append(ph.reshape(n * h * w, 4 * c))
    return jnp.stack(phases, axis=0)                     # (4, M, 4*C)


def _phase_weights(w_t):
    """PyTorch ConvTranspose2d weight (C_in, C_out, 4, 4) -> (4, 4*C_in, C_out).

    Row order matches the (dy, dx, ic) column order of _phase_patches; tap
    (dy, dx) of phase (py, px) picks kernel element (3-py-2*dy, 3-px-2*dx).
    """
    mats = []
    for py in range(2):
        for px in range(2):
            rows = [w_t[:, :, 3 - py - 2 * dy, 3 - px - 2 * dx]
                    for dy in range(2) for dx in range(2)]
            mats.append(jnp.concatenate(rows, axis=0))   # (4*C_in, C_out)
    return jnp.stack(mats, axis=0)                       # (4, 4*C_in, C_out)


def _interleave_phases(y_phases, n, h, w, c):
    """(4, N*H*W, C) with p = 2*py+px  ->  (N, 2H, 2W, C)."""
    y = y_phases.reshape(2, 2, n, h, w, c)
    y = jnp.transpose(y, (2, 3, 0, 4, 1, 5))             # (N, H, py, W, px, C)
    return y.reshape(n, 2 * h, 2 * w, c)


# ------------------------------ layer wrappers -----------------------------

def deconv_bn_prelu(x_nhwc, w_t, gamma, beta, alpha):
    n, h, w, _ = x_nhwc.shape
    c_out = w_t.shape[1]
    m = n * h * w
    tile_m = _choose_tile_m(m)
    m_pad = _round_up(m, tile_m)

    patches = _phase_patches(x_nhwc.astype(jnp.bfloat16))
    patches = jnp.pad(patches, ((0, 0), (0, m_pad - m), (0, 0)))
    wmats = _phase_weights(w_t).astype(jnp.bfloat16)

    # Pass 1: tiled matmul + partial batch statistics (sum, sum of squares).
    y, s_part, q_part = _run_deconv_mm_stats(patches, wmats, tile_m)

    # Fold statistics over the FULL N*OH*OW extent.  Padded rows are exact
    # zeros in both sums, so only the real element count enters the mean.
    count = 4.0 * m
    total = jnp.sum(s_part[:, :, 0, :], axis=(0, 1))
    total_sq = jnp.sum(q_part[:, :, 0, :], axis=(0, 1))
    mean = total / count
    var = total_sq / count - mean * mean                 # biased var (PyTorch BN)
    scale = gamma * lax.rsqrt(var + _EPS)
    shift = beta - scale * mean
    alpha_row = jnp.broadcast_to(alpha.reshape(1, -1), (1, c_out))

    # Pass 2: tiled fused BN-apply + PReLU.
    act = _run_bn_prelu(y.reshape(4 * m_pad, c_out),
                        scale.reshape(1, c_out).astype(jnp.float32),
                        shift.reshape(1, c_out).astype(jnp.float32),
                        alpha_row.astype(jnp.float32), tile_m)
    act = act.reshape(4, m_pad, c_out)[:, :m, :]
    return _interleave_phases(act, n, h, w, c_out)


def deconv_sigmoid(x_nhwc, w_t):
    n, h, w, _ = x_nhwc.shape
    c_out = w_t.shape[1]
    c_pad = _round_up(c_out, 128)                        # lane-dense stores
    m = n * h * w
    tile_m = _choose_tile_m(m)
    m_pad = _round_up(m, tile_m)

    patches = _phase_patches(x_nhwc.astype(jnp.bfloat16))
    patches = jnp.pad(patches, ((0, 0), (0, m_pad - m), (0, 0)))
    wmats = _phase_weights(w_t)
    wmats = jnp.pad(wmats, ((0, 0), (0, 0), (0, c_pad - c_out)))
    wmats = wmats.astype(jnp.bfloat16)

    out = _run_deconv_sigmoid(patches, wmats, tile_m)
    out = out[:, :m, :c_out]
    return _interleave_phases(out, n, h, w, c_out)


# ------------------------------ model driver -------------------------------

def init_params(key, input_dim, latent_dim, hidden_dims):
    ks = jax.random.split(key, 16)
    params = {}
    out_d1 = hidden_dims[-1] * 2 * 2
    bound = 1.0 / (latent_dim ** 0.5)
    params["d1_w"] = jax.random.uniform(ks[0], (latent_dim, out_d1),
                                        jnp.float32, -bound, bound)
    params["d1_b"] = jax.random.uniform(ks[1], (out_d1,),
                                        jnp.float32, -bound, bound)
    layers = []
    ki = 2
    for i in range(len(hidden_dims) - 1):
        c_in = hidden_dims[-1 - i]
        c_out = hidden_dims[-2 - i]
        w = 0.05 * jax.random.normal(ks[ki], (c_in, c_out, 4, 4), jnp.float32)
        ki += 1
        gamma = 0.5 + 0.1 * jnp.abs(jax.random.normal(ks[ki], (c_out,), jnp.float32))
        ki += 1
        beta = 0.1 * jax.random.normal(ks[ki], (c_out,), jnp.float32)
        ki += 1
        alpha = jnp.asarray([0.25], jnp.float32)         # PyTorch PReLU default
        layers.append((w, gamma, beta, alpha))
    params["layers"] = layers
    params["w_out"] = 0.05 * jax.random.normal(
        ks[ki], (hidden_dims[0], input_dim, 4, 4), jnp.float32)
    return params


def pxz_forward(params, z, hidden_dims):
    # d1: a (batch, latent) x (latent, 4*C) sliver -- below Pallas launch
    # overhead (per perf review), so it stays a plain XLA dot.
    h = jnp.dot(z, params["d1_w"]) + params["d1_b"]
    n = h.shape[0]
    c = hidden_dims[-1]
    # PyTorch: h.view(-1, C, 2, 2) is NCHW; internal layout is NHWC.
    x = h.reshape(n, c, 2, 2).transpose(0, 2, 3, 1)      # (N, 2, 2, C)
    for (w, gamma, beta, alpha) in params["layers"]:
        x = deconv_bn_prelu(x, w, gamma, beta, alpha)
    x = deconv_sigmoid(x, params["w_out"])
    return x.transpose(0, 3, 1, 2)                       # back to NCHW


# --------------------------- pure-XLA reference ----------------------------

def _ref_deconv(x_nhwc, w_t):
    # ConvTranspose2d(k=4,s=2,p=1) == lhs-dilated conv with the flipped kernel.
    wf = jnp.transpose(w_t[:, :, ::-1, ::-1], (2, 3, 0, 1))     # HWIO
    return lax.conv_general_dilated(
        x_nhwc.astype(jnp.bfloat16), wf.astype(jnp.bfloat16),
        window_strides=(1, 1), padding=((2, 2), (2, 2)), lhs_dilation=(2, 2),
        dimension_numbers=("NHWC", "HWIO", "NHWC"),
        preferred_element_type=jnp.float32)


def ref_forward(params, z, hidden_dims):
    h = jnp.dot(z, params["d1_w"]) + params["d1_b"]
    n = h.shape[0]
    x = h.reshape(n, hidden_dims[-1], 2, 2).transpose(0, 2, 3, 1)
    for (w, gamma, beta, alpha) in params["layers"]:
        y = _ref_deconv(x, w)
        mean = jnp.mean(y, axis=(0, 1, 2))
        var = jnp.var(y, axis=(0, 1, 2))
        zz = gamma * ((y - mean) * lax.rsqrt(var + _EPS)) + beta
        x = jnp.where(zz >= 0.0, zz, alpha[0] * zz)
    y = jax.nn.sigmoid(_ref_deconv(x, params["w_out"]))
    return y.transpose(0, 3, 1, 2)


if __name__ == "__main__":
    input_dim, latent_dim = 3, 16
    hidden_dims = [8, 16, 32]        # small version of [128,256,512,1024,1024]
    batch = 2

    key = jax.random.PRNGKey(0)
    kp, kz = jax.random.split(key)
    params = init_params(kp, input_dim, latent_dim, hidden_dims)
    z = jax.random.normal(kz, (batch, latent_dim), jnp.float32)

    fwd = jax.jit(functools.partial(pxz_forward, hidden_dims=hidden_dims))
    x_rec = jax.block_until_ready(fwd(params, z))

    # 2 -> 4 -> 8 -> 16 spatial upsampling, sigmoid output in [0, 1].
    assert x_rec.shape == (batch, input_dim, 16, 16), x_rec.shape
    assert x_rec.dtype == jnp.float32
    assert bool(jnp.all((x_rec >= 0.0) & (x_rec <= 1.0)))

    # Structural correctness check against a pure-XLA reference (same bf16
    # MXU operand dtype, f32 accumulation).
    ref = jax.jit(functools.partial(ref_forward, hidden_dims=hidden_dims))
    x_ref = jax.block_until_ready(ref(params, z))
    assert bool(jnp.allclose(x_rec, x_ref, atol=1e-2, rtol=1e-2)), \
        float(jnp.max(jnp.abs(x_rec - x_ref)))

    print("KERNEL_OK")
</pallas_src>

<mosaic_0001>
module attributes {stable_mosaic.version = 11 : i64} {
  func.func @_deconv_mm_stats_kernel(%arg0: i32, %arg1: i32, %arg2: memref<1x16x128xbf16, #tpu.memory_space<vmem>>, %arg3: memref<1x128x16xbf16, #tpu.memory_space<vmem>>, %arg4: memref<1x16x16xf32, #tpu.memory_space<vmem>>, %arg5: memref<1x1x8x16xf32, #tpu.memory_space<vmem>>, %arg6: memref<1x1x8x16xf32, #tpu.memory_space<vmem>>) attributes {dimension_semantics = [#tpu.dimension_semantics<parallel>, #tpu.dimension_semantics<parallel>], iteration_bounds = array<i64: 4, 1>, scalar_prefetch = 0 : i64, scratch_operands = 0 : i64, tpu.core_type = #tpu.core_type<tc>, window_params = [{transform_indices = @transform_0, window_bounds = array<i64: 1, 16, 128>}, {transform_indices = @transform_1, window_bounds = array<i64: 1, 128, 16>}, {transform_indices = @transform_2, window_bounds = array<i64: 1, 16, 16>}, {transform_indices = @transform_3, window_bounds = array<i64: 1, 1, 8, 16>}, {transform_indices = @transform_4, window_bounds = array<i64: 1, 1, 8, 16>}]} {
    %c0 = arith.constant 0 : index
    %c0_0 = arith.constant 0 : index
    %c0_1 = arith.constant 0 : index
    %0 = vector.load %arg2[%c0, %c0_0, %c0_1] : memref<1x16x128xbf16, #tpu.memory_space<vmem>>, vector<1x16x128xbf16>
    %1 = vector.shape_cast %0 : vector<1x16x128xbf16> to vector<16x128xbf16>
    %c0_2 = arith.constant 0 : index
    %c0_3 = arith.constant 0 : index
    %c0_4 = arith.constant 0 : index
    %2 = vector.load %arg3[%c0_2, %c0_3, %c0_4] : memref<1x128x16xbf16, #tpu.memory_space<vmem>>, vector<1x128x16xbf16>
    %3 = vector.shape_cast %2 : vector<1x128x16xbf16> to vector<128x16xbf16>
    %cst = arith.constant dense<0.000000e+00> : vector<16x16xf32>
    %4 = tpu.matmul %1, %3, %cst {dimension_numbers = #tpu.dot_dimension_numbers<[1], [0], [0], [1], [0, 0, 1, 1], [], []>} : vector<16x128xbf16>, vector<128x16xbf16>, vector<16x16xf32> -> vector<16x16xf32>
    %c0_5 = arith.constant 0 : index
    %c0_6 = arith.constant 0 : index
    %c0_7 = arith.constant 0 : index
    %5 = vector.load %arg4[%c0_5, %c0_6, %c0_7] : memref<1x16x16xf32, #tpu.memory_space<vmem>>, vector<1x16x16xf32>
    %6 = vector.shape_cast %5 : vector<1x16x16xf32> to vector<16x16xf32>
    %7 = vector.shape_cast %4 : vector<16x16xf32> to vector<1x16x16xf32>
    tpu.vector_store %arg4[%c0_5, %c0_6, %c0_7], %7 {strides = array<i32>} : memref<1x16x16xf32, #tpu.memory_space<vmem>>, vector<1x16x16xf32>,
    %cst_8 = arith.constant dense<0.000000e+00> : vector<16xf32>
    %8 = vector.multi_reduction <add>, %4, %cst_8 [0] : vector<16x16xf32> to vector<16xf32>
    %9 = vector.shape_cast %8 : vector<16xf32> to vector<1x16xf32>
    %10 = arith.mulf %4, %4 : vector<16x16xf32>
    %cst_9 = arith.constant dense<0.000000e+00> : vector<16xf32>
    %11 = vector.multi_reduction <add>, %10, %cst_9 [0] : vector<16x16xf32> to vector<16xf32>
    %12 = vector.shape_cast %11 : vector<16xf32> to vector<1x16xf32>
    %13 = vector.shape_cast %9 : vector<1x16xf32> to vector<1x16xf32>
    %14 = vector.broadcast %13 : vector<1x16xf32> to vector<8x16xf32>
    %c0_10 = arith.constant 0 : index
    %c0_11 = arith.constant 0 : index
    %c0_12 = arith.constant 0 : index
    %c0_13 = arith.constant 0 : index
    %15 = vector.load %arg5[%c0_10, %c0_11, %c0_12, %c0_13] : memref<1x1x8x16xf32, #tpu.memory_space<vmem>>, vector<1x1x8x16xf32>
    %16 = vector.shape_cast %15 : vector<1x1x8x16xf32> to vector<8x16xf32>
    %17 = vector.shape_cast %14 : vector<8x16xf32> to vector<1x1x8x16xf32>
    tpu.vector_store %arg5[%c0_10, %c0_11, %c0_12, %c0_13], %17 {strides = array<i32>} : memref<1x1x8x16xf32, #tpu.memory_space<vmem>>, vector<1x1x8x16xf32>,
    %18 = vector.shape_cast %12 : vector<1x16xf32> to vector<1x16xf32>
    %19 = vector.broadcast %18 : vector<1x16xf32> to vector<8x16xf32>
    %c0_14 = arith.constant 0 : index
    %c0_15 = arith.constant 0 : index
    %c0_16 = arith.constant 0 : index
    %c0_17 = arith.constant 0 : index
    %20 = vector.load %arg6[%c0_14, %c0_15, %c0_16, %c0_17] : memref<1x1x8x16xf32, #tpu.memory_space<vmem>>, vector<1x1x8x16xf32>
    %21 = vector.shape_cast %20 : vector<1x1x8x16xf32> to vector<8x16xf32>
    %22 = vector.shape_cast %19 : vector<8x16xf32> to vector<1x1x8x16xf32>
    tpu.vector_store %arg6[%c0_14, %c0_15, %c0_16, %c0_17], %22 {strides = array<i32>} : memref<1x1x8x16xf32, #tpu.memory_space<vmem>>, vector<1x1x8x16xf32>,
    return
  }
  func.func @transform_0(%arg0: i32, %arg1: i32) -> (i32, i32, i32) {
    %c0_i32 = arith.constant 0 : i32
    %c0_i32_0 = arith.constant 0 : i32
    return %arg0, %arg1, %c0_i32 : i32, i32, i32
  }
  func.func @transform_1(%arg0: i32, %arg1: i32) -> (i32, i32, i32) {
    %c0_i32 = arith.constant 0 : i32
    %c0_i32_0 = arith.constant 0 : i32
    %c0_i32_1 = arith.constant 0 : i32
    return %arg0, %c0_i32, %c0_i32_0 : i32, i32, i32
  }
  func.func @transform_2(%arg0: i32, %arg1: i32) -> (i32, i32, i32) {
    %c0_i32 = arith.constant 0 : i32
    %c0_i32_0 = arith.constant 0 : i32
    return %arg0, %arg1, %c0_i32 : i32, i32, i32
  }
  func.func @transform_3(%arg0: i32, %arg1: i32) -> (i32, i32, i32, i32) {
    %c0_i32 = arith.constant 0 : i32
    %c0_i32_0 = arith.constant 0 : i32
    %c0_i32_1 = arith.constant 0 : i32
    return %arg0, %arg1, %c0_i32, %c0_i32_0 : i32, i32, i32, i32
  }
  func.func @transform_4(%arg0: i32, %arg1: i32) -> (i32, i32, i32, i32) {
    %c0_i32 = arith.constant 0 : i32
    %c0_i32_0 = arith.constant 0 : i32
    %c0_i32_1 = arith.constant 0 : i32
    return %arg0, %arg1, %c0_i32, %c0_i32_0 : i32, i32, i32, i32
  }
}

module attributes {stable_mosaic.version = 11 : i64} {
  func.func @_bn_prelu_kernel(%arg0: i32, %arg1: memref<16x16xf32, #tpu.memory_space<vmem>>, %arg2: memref<1x16xf32, #tpu.memory_space<vmem>>, %arg3: memref<1x16xf32, #tpu.memory_space<vmem>>, %arg4: memref<1x16xf32, #tpu.memory_space<vmem>>, %arg5: memref<16x16xf32, #tpu.memory_space<vmem>>) attributes {dimension_semantics = [#tpu.dimension_semantics<parallel>], iteration_bounds = array<i64: 4>, scalar_prefetch = 0 : i64, scratch_operands = 0 : i64, tpu.core_type = #tpu.core_type<tc>, window_params = [{transform_indices = @transform_0, window_bounds = array<i64: 16, 16>}, {pipeline_mode = #tpu.pipeline_mode<synchronous>, transform_indices = @transform_1, window_bounds = array<i64: 1, 16>}, {pipeline_mode = #tpu.pipeline_mode<synchronous>, transform_indices = @transform_2, window_bounds = array<i64: 1, 16>}, {pipeline_mode = #tpu.pipeline_mode<synchronous>, transform_indices = @transform_3, window_bounds = array<i64: 1, 16>}, {transform_indices = @transform_4, window_bounds = array<i64: 16, 16>}]} {
    %c0 = arith.constant 0 : index
    %c0_0 = arith.constant 0 : index
    %0 = vector.load %arg1[%c0, %c0_0] : memref<16x16xf32, #tpu.memory_space<vmem>>, vector<16x16xf32>
    %c0_1 = arith.constant 0 : index
    %c0_2 = arith.constant 0 : index
    %1 = vector.load %arg2[%c0_1, %c0_2] : memref<1x16xf32, #tpu.memory_space<vmem>>, vector<1x16xf32>
    %2 = vector.broadcast %1 : vector<1x16xf32> to vector<16x16xf32>
    %3 = arith.mulf %0, %2 : vector<16x16xf32>
    %c0_3 = arith.constant 0 : index
    %c0_4 = arith.constant 0 : index
    %4 = vector.load %arg3[%c0_3, %c0_4] : memref<1x16xf32, #tpu.memory_space<vmem>>, vector<1x16xf32>
    %5 = vector.broadcast %4 : vector<1x16xf32> to vector<16x16xf32>
    %6 = arith.addf %3, %5 : vector<16x16xf32>
    %cst = arith.constant 0.000000e+00 : f32
    %7 = vector.broadcast %cst : f32 to vector<16x16xf32>
    %8 = arith.maximumf %6, %7 : vector<16x16xf32>
    %c0_5 = arith.constant 0 : index
    %c0_6 = arith.constant 0 : index
    %9 = vector.load %arg4[%c0_5, %c0_6] : memref<1x16xf32, #tpu.memory_space<vmem>>, vector<1x16xf32>
    %cst_7 = arith.constant 0.000000e+00 : f32
    %10 = vector.broadcast %cst_7 : f32 to vector<16x16xf32>
    %11 = arith.minimumf %6, %10 : vector<16x16xf32>
    %12 = vector.broadcast %9 : vector<1x16xf32> to vector<16x16xf32>
    %13 = arith.mulf %12, %11 : vector<16x16xf32>
    %14 = arith.addf %8, %13 : vector<16x16xf32>
    %c0_8 = arith.constant 0 : index
    %c0_9 = arith.constant 0 : index
    %15 = vector.load %arg5[%c0_8, %c0_9] : memref<16x16xf32, #tpu.memory_space<vmem>>, vector<16x16xf32>
    tpu.vector_store %arg5[%c0_8, %c0_9], %14 {strides = array<i32>} : memref<16x16xf32, #tpu.memory_space<vmem>>, vector<16x16xf32>,
    return
  }
  func.func @transform_0(%arg0: i32) -> (i32, i32) {
    %c0_i32 = arith.constant 0 : i32
    %c0_i32_0 = arith.constant 0 : i32
    return %arg0, %c0_i32 : i32, i32
  }
  func.func @transform_1(%arg0: i32) -> (i32, i32) {
    %c0_i32 = arith.constant 0 : i32
    %c0_i32_0 = arith.constant 0 : i32
    %c0_i32_1 = arith.constant 0 : i32
    return %c0_i32, %c0_i32_0 : i32, i32
  }
  func.func @transform_2(%arg0: i32) -> (i32, i32) {
    %c0_i32 = arith.constant 0 : i32
    %c0_i32_0 = arith.constant 0 : i32
    %c0_i32_1 = arith.constant 0 : i32
    return %c0_i32, %c0_i32_0 : i32, i32
  }
  func.func @transform_3(%arg0: i32) -> (i32, i32) {
    %c0_i32 = arith.constant 0 : i32
    %c0_i32_0 = arith.constant 0 : i32
    %c0_i32_1 = arith.constant 0 : i32
    return %c0_i32, %c0_i32_0 : i32, i32
  }
  func.func @transform_4(%arg0: i32) -> (i32, i32) {
    %c0_i32 = arith.constant 0 : i32
    %c0_i32_0 = arith.constant 0 : i32
    return %arg0, %c0_i32 : i32, i32
  }
}

module attributes {stable_mosaic.version = 11 : i64} {
  func.func @_deconv_mm_stats_kernel(%arg0: i32, %arg1: i32, %arg2: memref<1x32x64xbf16, #tpu.memory_space<vmem>>, %arg3: memref<1x64x8xbf16, #tpu.memory_space<vmem>>, %arg4: memref<1x32x8xf32, #tpu.memory_space<vmem>>, %arg5: memref<1x1x8x8xf32, #tpu.memory_space<vmem>>, %arg6: memref<1x1x8x8xf32, #tpu.memory_space<vmem>>) attributes {dimension_semantics = [#tpu.dimension_semantics<parallel>, #tpu.dimension_semantics<parallel>], iteration_bounds = array<i64: 4, 1>, scalar_prefetch = 0 : i64, scratch_operands = 0 : i64, tpu.core_type = #tpu.core_type<tc>, window_params = [{transform_indices = @transform_0, window_bounds = array<i64: 1, 32, 64>}, {transform_indices = @transform_1, window_bounds = array<i64: 1, 64, 8>}, {transform_indices = @transform_2, window_bounds = array<i64: 1, 32, 8>}, {transform_indices = @transform_3, window_bounds = array<i64: 1, 1, 8, 8>}, {transform_indices = @transform_4, window_bounds = array<i64: 1, 1, 8, 8>}]} {
    %c0 = arith.constant 0 : index
    %c0_0 = arith.constant 0 : index
    %c0_1 = arith.constant 0 : index
    %0 = vector.load %arg2[%c0, %c0_0, %c0_1] : memref<1x32x64xbf16, #tpu.memory_space<vmem>>, vector<1x32x64xbf16>
    %1 = vector.shape_cast %0 : vector<1x32x64xbf16> to vector<32x64xbf16>
    %c0_2 = arith.constant 0 : index
    %c0_3 = arith.constant 0 : index
    %c0_4 = arith.constant 0 : index
    %2 = vector.load %arg3[%c0_2, %c0_3, %c0_4] : memref<1x64x8xbf16, #tpu.memory_space<vmem>>, vector<1x64x8xbf16>
    %3 = vector.shape_cast %2 : vector<1x64x8xbf16> to vector<64x8xbf16>
    %cst = arith.constant dense<0.000000e+00> : vector<32x8xf32>
    %4 = tpu.matmul %1, %3, %cst {dimension_numbers = #tpu.dot_dimension_numbers<[1], [0], [0], [1], [0, 0, 1, 1], [], []>} : vector<32x64xbf16>, vector<64x8xbf16>, vector<32x8xf32> -> vector<32x8xf32>
    %c0_5 = arith.constant 0 : index
    %c0_6 = arith.constant 0 : index
    %c0_7 = arith.constant 0 : index
    %5 = vector.load %arg4[%c0_5, %c0_6, %c0_7] : memref<1x32x8xf32, #tpu.memory_space<vmem>>, vector<1x32x8xf32>
    %6 = vector.shape_cast %5 : vector<1x32x8xf32> to vector<32x8xf32>
    %7 = vector.shape_cast %4 : vector<32x8xf32> to vector<1x32x8xf32>
    tpu.vector_store %arg4[%c0_5, %c0_6, %c0_7], %7 {strides = array<i32>} : memref<1x32x8xf32, #tpu.memory_space<vmem>>, vector<1x32x8xf32>,
    %cst_8 = arith.constant dense<0.000000e+00> : vector<8xf32>
    %8 = vector.multi_reduction <add>, %4, %cst_8 [0] : vector<32x8xf32> to vector<8xf32>
    %9 = vector.shape_cast %8 : vector<8xf32> to vector<1x8xf32>
    %10 = arith.mulf %4, %4 : vector<32x8xf32>
    %cst_9 = arith.constant dense<0.000000e+00> : vector<8xf32>
    %11 = vector.multi_reduction <add>, %10, %cst_9 [0] : vector<32x8xf32> to vector<8xf32>
    %12 = vector.shape_cast %11 : vector<8xf32> to vector<1x8xf32>
    %13 = vector.shape_cast %9 : vector<1x8xf32> to vector<1x8xf32>
    %14 = vector.broadcast %13 : vector<1x8xf32> to vector<8x8xf32>
    %c0_10 = arith.constant 0 : index
    %c0_11 = arith.constant 0 : index
    %c0_12 = arith.constant 0 : index
    %c0_13 = arith.constant 0 : index
    %15 = vector.load %arg5[%c0_10, %c0_11, %c0_12, %c0_13] : memref<1x1x8x8xf32, #tpu.memory_space<vmem>>, vector<1x1x8x8xf32>
    %16 = vector.shape_cast %15 : vector<1x1x8x8xf32> to vector<8x8xf32>
    %17 = vector.shape_cast %14 : vector<8x8xf32> to vector<1x1x8x8xf32>
    tpu.vector_store %arg5[%c0_10, %c0_11, %c0_12, %c0_13], %17 {strides = array<i32>} : memref<1x1x8x8xf32, #tpu.memory_space<vmem>>, vector<1x1x8x8xf32>,
    %18 = vector.shape_cast %12 : vector<1x8xf32> to vector<1x8xf32>
    %19 = vector.broadcast %18 : vector<1x8xf32> to vector<8x8xf32>
    %c0_14 = arith.constant 0 : index
    %c0_15 = arith.constant 0 : index
    %c0_16 = arith.constant 0 : index
    %c0_17 = arith.constant 0 : index
    %20 = vector.load %arg6[%c0_14, %c0_15, %c0_16, %c0_17] : memref<1x1x8x8xf32, #tpu.memory_space<vmem>>, vector<1x1x8x8xf32>
    %21 = vector.shape_cast %20 : vector<1x1x8x8xf32> to vector<8x8xf32>
    %22 = vector.shape_cast %19 : vector<8x8xf32> to vector<1x1x8x8xf32>
    tpu.vector_store %arg6[%c0_14, %c0_15, %c0_16, %c0_17], %22 {strides = array<i32>} : memref<1x1x8x8xf32, #tpu.memory_space<vmem>>, vector<1x1x8x8xf32>,
    return
  }
  func.func @transform_0(%arg0: i32, %arg1: i32) -> (i32, i32, i32) {
    %c0_i32 = arith.constant 0 : i32
    %c0_i32_0 = arith.constant 0 : i32
    return %arg0, %arg1, %c0_i32 : i32, i32, i32
  }
  func.func @transform_1(%arg0: i32, %arg1: i32) -> (i32, i32, i32) {
    %c0_i32 = arith.constant 0 : i32
    %c0_i32_0 = arith.constant 0 : i32
    %c0_i32_1 = arith.constant 0 : i32
    return %arg0, %c0_i32, %c0_i32_0 : i32, i32, i32
  }
  func.func @transform_2(%arg0: i32, %arg1: i32) -> (i32, i32, i32) {
    %c0_i32 = arith.constant 0 : i32
    %c0_i32_0 = arith.constant 0 : i32
    return %arg0, %arg1, %c0_i32 : i32, i32, i32
  }
  func.func @transform_3(%arg0: i32, %arg1: i32) -> (i32, i32, i32, i32) {
    %c0_i32 = arith.constant 0 : i32
    %c0_i32_0 = arith.constant 0 : i32
    %c0_i32_1 = arith.constant 0 : i32
    return %arg0, %arg1, %c0_i32, %c0_i32_0 : i32, i32, i32, i32
  }
  func.func @transform_4(%arg0: i32, %arg1: i32) -> (i32, i32, i32, i32) {
    %c0_i32 = arith.constant 0 : i32
    %c0_i32_0 = arith.constant 0 : i32
    %c0_i32_1 = arith.constant 0 : i32
    return %arg0, %arg1, %c0_i32, %c0_i32_0 : i32, i32, i32, i32
  }
}

module attributes {stable_mosaic.version = 11 : i64} {
  func.func @_bn_prelu_kernel(%arg0: i32, %arg1: memref<32x8xf32, #tpu.memory_space<vmem>>, %arg2: memref<1x8xf32, #tpu.memory_space<vmem>>, %arg3: memref<1x8xf32, #tpu.memory_space<vmem>>, %arg4: memref<1x8xf32, #tpu.memory_space<vmem>>, %arg5: memref<32x8xf32, #tpu.memory_space<vmem>>) attributes {dimension_semantics = [#tpu.dimension_semantics<parallel>], iteration_bounds = array<i64: 4>, scalar_prefetch = 0 : i64, scratch_operands = 0 : i64, tpu.core_type = #tpu.core_type<tc>, window_params = [{transform_indices = @transform_0, window_bounds = array<i64: 32, 8>}, {pipeline_mode = #tpu.pipeline_mode<synchronous>, transform_indices = @transform_1, window_bounds = array<i64: 1, 8>}, {pipeline_mode = #tpu.pipeline_mode<synchronous>, transform_indices = @transform_2, window_bounds = array<i64: 1, 8>}, {pipeline_mode = #tpu.pipeline_mode<synchronous>, transform_indices = @transform_3, window_bounds = array<i64: 1, 8>}, {transform_indices = @transform_4, window_bounds = array<i64: 32, 8>}]} {
    %c0 = arith.constant 0 : index
    %c0_0 = arith.constant 0 : index
    %0 = vector.load %arg1[%c0, %c0_0] : memref<32x8xf32, #tpu.memory_space<vmem>>, vector<32x8xf32>
    %c0_1 = arith.constant 0 : index
    %c0_2 = arith.constant 0 : index
    %1 = vector.load %arg2[%c0_1, %c0_2] : memref<1x8xf32, #tpu.memory_space<vmem>>, vector<1x8xf32>
    %2 = vector.broadcast %1 : vector<1x8xf32> to vector<32x8xf32>
    %3 = arith.mulf %0, %2 : vector<32x8xf32>
    %c0_3 = arith.constant 0 : index
    %c0_4 = arith.constant 0 : index
    %4 = vector.load %arg3[%c0_3, %c0_4] : memref<1x8xf32, #tpu.memory_space<vmem>>, vector<1x8xf32>
    %5 = vector.broadcast %4 : vector<1x8xf32> to vector<32x8xf32>
    %6 = arith.addf %3, %5 : vector<32x8xf32>
    %cst = arith.constant 0.000000e+00 : f32
    %7 = vector.broadcast %cst : f32 to vector<32x8xf32>
    %8 = arith.maximumf %6, %7 : vector<32x8xf32>
    %c0_5 = arith.constant 0 : index
    %c0_6 = arith.constant 0 : index
    %9 = vector.load %arg4[%c0_5, %c0_6] : memref<1x8xf32, #tpu.memory_space<vmem>>, vector<1x8xf32>
    %cst_7 = arith.constant 0.000000e+00 : f32
    %10 = vector.broadcast %cst_7 : f32 to vector<32x8xf32>
    %11 = arith.minimumf %6, %10 : vector<32x8xf32>
    %12 = vector.broadcast %9 : vector<1x8xf32> to vector<32x8xf32>
    %13 = arith.mulf %12, %11 : vector<32x8xf32>
    %14 = arith.addf %8, %13 : vector<32x8xf32>
    %c0_8 = arith.constant 0 : index
    %c0_9 = arith.constant 0 : index
    %15 = vector.load %arg5[%c0_8, %c0_9] : memref<32x8xf32, #tpu.memory_space<vmem>>, vector<32x8xf32>
    tpu.vector_store %arg5[%c0_8, %c0_9], %14 {strides = array<i32>} : memref<32x8xf32, #tpu.memory_space<vmem>>, vector<32x8xf32>,
    return
  }
  func.func @transform_0(%arg0: i32) -> (i32, i32) {
    %c0_i32 = arith.constant 0 : i32
    %c0_i32_0 = arith.constant 0 : i32
    return %arg0, %c0_i32 : i32, i32
  }
  func.func @transform_1(%arg0: i32) -> (i32, i32) {
    %c0_i32 = arith.constant 0 : i32
    %c0_i32_0 = arith.constant 0 : i32
    %c0_i32_1 = arith.constant 0 : i32
    return %c0_i32, %c0_i32_0 : i32, i32
  }
  func.func @transform_2(%arg0: i32) -> (i32, i32) {
    %c0_i32 = arith.constant 0 : i32
    %c0_i32_0 = arith.constant 0 : i32
    %c0_i32_1 = arith.constant 0 : i32
    return %c0_i32, %c0_i32_0 : i32, i32
  }
  func.func @transform_3(%arg0: i32) -> (i32, i32) {
    %c0_i32 = arith.constant 0 : i32
    %c0_i32_0 = arith.constant 0 : i32
    %c0_i32_1 = arith.constant 0 : i32
    return %c0_i32, %c0_i32_0 : i32, i32
  }
  func.func @transform_4(%arg0: i32) -> (i32, i32) {
    %c0_i32 = arith.constant 0 : i32
    %c0_i32_0 = arith.constant 0 : i32
    return %arg0, %c0_i32 : i32, i32
  }
}

module attributes {stable_mosaic.version = 11 : i64} {
  func.func @_deconv_sigmoid_kernel(%arg0: i32, %arg1: i32, %arg2: memref<1x128x32xbf16, #tpu.memory_space<vmem>>, %arg3: memref<1x32x128xbf16, #tpu.memory_space<vmem>>, %arg4: memref<1x128x128xf32, #tpu.memory_space<vmem>>) attributes {dimension_semantics = [#tpu.dimension_semantics<parallel>, #tpu.dimension_semantics<parallel>], iteration_bounds = array<i64: 4, 1>, scalar_prefetch = 0 : i64, scratch_operands = 0 : i64, tpu.core_type = #tpu.core_type<tc>, window_params = [{transform_indices = @transform_0, window_bounds = array<i64: 1, 128, 32>}, {transform_indices = @transform_1, window_bounds = array<i64: 1, 32, 128>}, {transform_indices = @transform_2, window_bounds = array<i64: 1, 128, 128>}]} {
    %c0 = arith.constant 0 : index
    %c0_0 = arith.constant 0 : index
    %c0_1 = arith.constant 0 : index
    %0 = vector.load %arg2[%c0, %c0_0, %c0_1] : memref<1x128x32xbf16, #tpu.memory_space<vmem>>, vector<1x128x32xbf16>
    %1 = vector.shape_cast %0 : vector<1x128x32xbf16> to vector<128x32xbf16>
    %c0_2 = arith.constant 0 : index
    %c0_3 = arith.constant 0 : index
    %c0_4 = arith.constant 0 : index
    %2 = vector.load %arg3[%c0_2, %c0_3, %c0_4] : memref<1x32x128xbf16, #tpu.memory_space<vmem>>, vector<1x32x128xbf16>
    %3 = vector.shape_cast %2 : vector<1x32x128xbf16> to vector<32x128xbf16>
    %cst = arith.constant dense<0.000000e+00> : vector<128x128xf32>
    %4 = tpu.matmul %1, %3, %cst {dimension_numbers = #tpu.dot_dimension_numbers<[1], [0], [0], [1], [0, 0, 1, 1], [], []>} : vector<128x32xbf16>, vector<32x128xbf16>, vector<128x128xf32> -> vector<128x128xf32>
    %5 = arith.negf %4 : vector<128x128xf32>
    %6 = math.exp %5 : vector<128x128xf32>
    %cst_5 = arith.constant 1.000000e+00 : f32
    %7 = vector.broadcast %cst_5 : f32 to vector<128x128xf32>
    %8 = arith.addf %7, %6 : vector<128x128xf32>
    %9 = arith.divf %7, %8 : vector<128x128xf32>
    %c0_6 = arith.constant 0 : index
    %c0_7 = arith.constant 0 : index
    %c0_8 = arith.constant 0 : index
    %10 = vector.load %arg4[%c0_6, %c0_7, %c0_8] : memref<1x128x128xf32, #tpu.memory_space<vmem>>, vector<1x128x128xf32>
    %11 = vector.shape_cast %10 : vector<1x128x128xf32> to vector<128x128xf32>
    %12 = vector.shape_cast %9 : vector<128x128xf32> to vector<1x128x128xf32>
    tpu.vector_store %arg4[%c0_6, %c0_7, %c0_8], %12 {strides = array<i32>} : memref<1x128x128xf32, #tpu.memory_space<vmem>>, vector<1x128x128xf32>,
    return
  }
  func.func @transform_0(%arg0: i32, %arg1: i32) -> (i32, i32, i32) {
    %c0_i32 = arith.constant 0 : i32
    %c0_i32_0 = arith.constant 0 : i32
    return %arg0, %arg1, %c0_i32 : i32, i32, i32
  }
  func.func @transform_1(%arg0: i32, %arg1: i32) -> (i32, i32, i32) {
    %c0_i32 = arith.constant 0 : i32
    %c0_i32_0 = arith.constant 0 : i32
    %c0_i32_1 = arith.constant 0 : i32
    return %arg0, %c0_i32, %c0_i32_0 : i32, i32, i32
  }
  func.func @transform_2(%arg0: i32, %arg1: i32) -> (i32, i32, i32) {
    %c0_i32 = arith.constant 0 : i32
    %c0_i32_0 = arith.constant 0 : i32
    return %arg0, %arg1, %c0_i32 : i32, i32, i32
  }
}

</mosaic_0001>

<bundles_post_ra>
// kernel: pxz_forward.5
= control target key start
LH: loop header
LB: loop body
LE: loop exit
PB: predicated region body
PF: predicated region fallthrough
CT: control target
= control target key end

     0   :  { %s722_s15 = smov 0   ;;  %s724_s16 = smov 0   ;;  %s777_s0 = inlined_call_operand.vmem [shape: bf16[4,16,128], index: 0, kind: input, shape index: {}]   ;;  %s778_s1 = inlined_call_operand.vmem [shape: bf16[4,128,16], index: 1, kind: input, shape index: {}]   ;;  %s779_s2 = inlined_call_operand.vmem [shape: f32[4,16,16], index: 2, kind: output, shape index: {0}]   ;;  %s780_s3 = inlined_call_operand.vmem [shape: f32[4,1,8,16], index: 3, kind: output, shape index: {1}]   ;;  %s781_s4 = inlined_call_operand.vmem [shape: f32[4,1,8,16], index: 4, kind: output, shape index: {2}]  }
   0x1   :  { %s726_s17 = smov 0  }
   0x2 LB: > { %s27_s18 = sadd.s32 1, %s691_s16  ;;  %p590_p0 = scmp.ge.s32.totalorder %s695_s17, 1  ;;  %s695_s17 = sphi %s726_s17, %s15_s17   ;;  %s691_s16 = sphi %s724_s16, %s783_s16   ;;  %s687_s15 = sphi %s722_s15, %s782_s15  }
   0x3   : > { %p29_p1 = scmp.ge.s32.totalorder %s27_s18, 4  ;;  %p202_p2 = scmp.lt.s32.totalorder %s695_s17, 5 }
   0x5   : > { %s785_s18 = smov (%p29_p1, %s27_s18), 0  ;;  %p203_p3 = pnand %p590_p0, %p202_p2 }
   0x6   : > { %p256_p4 = scmp.lt.s32.totalorder (!%p203_p3), %s687_s15, 3 }
   0x7   : > { %206 = sbr.rel (%p203_p3) target bundleno = 199 (0xc7), region = 28 }
   0xc   : > { %s787_s15 = smov (!%p256_p4, %s687_s15), 3  ;;  %vm380_vm0 = vcmask 130048  }
   0xd   : > { %s638_s19 = sshll.u32 %s787_s15, 6  ;;  %s743_s23 = sshll.u32 %s787_s15, 3 }
   0xe   : > { %s269_s22 = scalar_lea.vmem %s778_s1, %s638_s19  ;;  %s263_s26 = scalar_lea.vmem %s777_s0, %s743_s23 }
   0xf   : > { %v648_v0 = vld [vmem:[%s269_s22 + $0x38] sm:$0xff]  ;;  %v647_v1 = vld [vmem:[%s269_s22 + $0x30] sm:$0xff]  ;;  %v646_v2 = vld [vmem:[%s269_s22 + $0x28] sm:$0xff]  ;;  %s639_s27 = sshll.u32 %s787_s15, 4  ;;  %s286_s7 = scalar_lea.vmem %s780_s3, %s743_s23 }
  0x10   : > { %366 = vmatpush.bf16.msra.mxu0 %v648_v0  ;;  %v645_v3 = vld [vmem:[%s269_s22 + $0x20] sm:$0xff]  ;;  %v644_v4 = vld [vmem:[%s269_s22 + $0x18] sm:$0xff]  ;;  %v643_v5 = vld [vmem:[%s269_s22 + $0x10] sm:$0xff]  ;;  %s278_s30 = scalar_lea.vmem %s779_s2, %s639_s27  ;;  %s293_s10 = scalar_lea.vmem %s781_s4, %s743_s23 }
  0x11   : > { %v642_v6 = vld [vmem:[%s269_s22 + $0x8] sm:$0xff]  ;;  %v641_v7 = vld [vmem:[%s269_s22] sm:$0xff] }
  0x12   : > { %v640_v8 = vld [vmem:[%s263_s26] sm:$0xff] }
  0x14   : > { %367 = vmatpush.bf16.msra.mxu0 %v647_v1 }
  0x18   : > { %368 = vmatpush.bf16.msra.mxu0 %v646_v2 }
  0x1c   : > { %369 = vmatpush.bf16.msra.mxu0 %v645_v3 }
  0x20   : > { %370 = vmatpush.bf16.msra.mxu0 %v644_v4 }
  0x24   : > { %371 = vmatpush.bf16.msra.mxu0 %v643_v5 }
  0x28   : > { %372 = vmatpush.bf16.msra.mxu0 %v642_v6 }
  0x2c   : > { %373 = vmatpush.bf16.msra.mxu0 %v641_v7 }
  0x2f   : > { %374 = vmatmul.bf16.vlgmr.msra.gmra.mxu0 %v640_v8 }
  0xac   : > { %v375_v9 = vpop.f32.mrf.mxu0 }
  0xad   : > { %381 = vst.msk [vmem:[%s278_s30] sm:$0xff] %vm380_vm0, %v375_v9  ;;  %v392_v10 = vmul.f32 %v375_v9, %v375_v9  ;;  %v383_v12 = vsel %vm380_vm0, %v375_v9, 0.0 }
  0xaf   : > { %v394_v16 = vsel %vm380_vm0, %v392_v10, 0.0 }
  0xb4   : > { %v377_v11 = vpop.f32.mrf.mxu0 }
  0xb5   : > { %382 = vst.msk [vmem:[%s278_s30 + $0x8] sm:$0xff] %vm380_vm0, %v377_v11  ;;  %v384_v13 = vsel %vm380_vm0, %v377_v11, 0.0  ;;  %v393_v14 = vmul.f32 %v377_v11, %v377_v11 }
  0xb6   : > { %v385_v15 = vadd.f32 %v384_v13, %v383_v12 }
  0xb7   : > { %v395_v17 = vsel %vm380_vm0, %v393_v14, 0.0 }
  0xb8   : > { %v386_v18 = vrot.slane %v385_v15, 4  ;;  %v396_v19 = vadd.f32 %v395_v17, %v394_v16 }
  0xba   : > { %v387_v20 = vadd.f32 %v386_v18, %v385_v15  ;;  %v397_v21 = vrot.slane %v396_v19, 4 }
  0xbc   : > { %v388_v22 = vrot.slane %v387_v20, 2  ;;  %v398_v23 = vadd.f32 %v397_v21, %v396_v19 }
  0xbe   : > { %v389_v24 = vadd.f32 %v388_v22, %v387_v20  ;;  %v399_v25 = vrot.slane %v398_v23, 2 }
  0xc0   : > { %v390_v26 = vrot.slane %v389_v24, 1  ;;  %v400_v27 = vadd.f32 %v399_v25, %v398_v23 }
  0xc2   : > { %v391_v28 = vadd.f32 %v390_v26, %v389_v24  ;;  %v401_v29 = vrot.slane %v400_v27, 1 }
  0xc4   : > { %v402_v30 = vadd.f32 %v401_v29, %v400_v27  ;;  %403 = vst.msk [vmem:[%s286_s7] sm:$0xff] %vm380_vm0, %v391_v28 }
  0xc6   : > { %404 = vst.msk [vmem:[%s293_s10] sm:$0xff] %vm380_vm0, %v402_v30 }
  0xc7 PF: > { %s15_s17 = sadd.s32 1, %s695_s17   ;;  %s782_s15 = smov %s691_s16 }
  0xc8   : > { %p12_p5 = scmp.ge.s32.totalorder %s15_s17, 6   ;;  %s783_s16 = smov %s785_s18 }
  0xca   :  { %14 = sbr.rel (!%p12_p5) target bundleno = 2 (0x2), region = 85 }

// kernel: pxz_forward.6
= control target key start
LH: loop header
LB: loop body
LE: loop exit
PB: predicated region body
PF: predicated region fallthrough
CT: control target
= control target key end

     0   :  { %s341_s15 = smov 0   ;;  %s367_s0 = inlined_call_operand.vmem [shape: f32[64,16], index: 0, kind: input, shape index: {}]   ;;  %s368_s1 = inlined_call_operand.vmem [shape: f32[1,16], index: 1, kind: input, shape index: {}]   ;;  %s369_s2 = inlined_call_operand.vmem [shape: f32[1,16], index: 2, kind: input, shape index: {}]   ;;  %s370_s3 = inlined_call_operand.vmem [shape: f32[1,16], index: 3, kind: input, shape index: {}]   ;;  %s371_s4 = inlined_call_operand.vmem [shape: f32[64,16], index: 4, kind: output, shape index: {}]  }
   0x1 LB: > { %s286_s16 = sadd.s32 4294967295, %s314_s15   ;;  %p290_p0 = scmp.ge.s32.totalorder %s314_s15, 1  ;;  %s314_s15 = sphi %s341_s15, %s14_s15  }
   0x2   : > { %p163_p1 = scmp.lt.s32.totalorder %s314_s15, 5 }
   0x4   : > { %p164_p2 = pnand %p290_p0, %p163_p1 }
   0x5   : > { %s291_s17 = sshll.u32 (!%p164_p2), %s286_s16, 1 }
   0x6   : > { %167 = sbr.rel (%p164_p2) target bundleno = 27 (0x1b), region = 36  ;;  %p190_p3 = scmp.lt.s32.totalorder (!%p164_p2), %s291_s17, 7 }
   0xb   : > { %s373_s17 = smov (!%p190_p3, %s291_s17), 7  ;;  %v305_v0 = vld [vmem:[%s368_s1] ss:$0 sm:$0xff]  ;;  %vm227_vm0 = vcmask 130048  }
   0xc   : > { %s292_s20 = sshll.u32 %s373_s17, 3  ;;  %v306_v1 = vld [vmem:[%s369_s2] ss:$0 sm:$0xff] }
   0xd   : > { %s193_s23 = scalar_lea.vmem %s367_s0, %s292_s20  ;;  %v307_v8 = vld [vmem:[%s370_s3] ss:$0 sm:$0xff]  ;;  %s199_s30 = scalar_lea.vmem %s371_s4, %s292_s20 }
   0xe   : > { %v201_v2 = vld [vmem:[%s193_s23] sm:$0xff]  ;;  %v202_v3 = vld [vmem:[%s193_s23 + $0x8] sm:$0xff] }
   0xf   : > { %v207_v4 = vmul.f32 %v305_v0, %v201_v2  ;;  %v208_v5 = vmul.f32 %v305_v0, %v202_v3 }
  0x11   : > { %v213_v6 = vadd.f32 %v306_v1, %v207_v4  ;;  %v214_v7 = vadd.f32 %v306_v1, %v208_v5 }
  0x13   : > { %v215_v9 = vmax.f32 %v213_v6, 0.0  ;;  %v218_v10 = vmin.f32 %v213_v6, 0.0  ;;  %v219_v11 = vmin.f32 %v214_v7, 0.0  ;;  %v216_v12 = vmax.f32 %v214_v7, 0.0 }
  0x15   : > { %v223_v13 = vmul.f32 %v307_v8, %v218_v10  ;;  %v224_v14 = vmul.f32 %v307_v8, %v219_v11 }
  0x17   : > { %v225_v15 = vadd.f32 %v223_v13, %v215_v9  ;;  %v226_v16 = vadd.f32 %v224_v14, %v216_v12 }
  0x19   : > { %228 = vst.msk [vmem:[%s199_s30] sm:$0xff] %vm227_vm0, %v225_v15 }
  0x1a   : > { %229 = vst.msk [vmem:[%s199_s30 + $0x8] sm:$0xff] %vm227_vm0, %v226_v16 }
  0x1b PF: > { %s14_s15 = sadd.s32 1, %s314_s15  }
  0x1c   : > { %p11_p4 = scmp.ge.s32.totalorder %s14_s15, 6  }
  0x1e   :  { %13 = sbr.rel (!%p11_p4) target bundleno = 1 (0x1), region = 66 }

// kernel: pxz_forward.7
= control target key start
LH: loop header
LB: loop body
LE: loop exit
PB: predicated region body
PF: predicated region fallthrough
CT: control target
= control target key end

     0   :  { %s712_s15 = smov 0   ;;  %s714_s16 = smov 0   ;;  %s773_s0 = inlined_call_operand.vmem [shape: bf16[4,32,64], index: 0, kind: input, shape index: {}]   ;;  %s774_s1 = inlined_call_operand.vmem [shape: bf16[4,64,8], index: 1, kind: input, shape index: {}]   ;;  %s775_s2 = inlined_call_operand.vmem [shape: f32[4,32,8], index: 2, kind: output, shape index: {0}]   ;;  %s776_s3 = inlined_call_operand.vmem [shape: f32[4,1,8,8], index: 3, kind: output, shape index: {1}]   ;;  %s777_s4 = inlined_call_operand.vmem [shape: f32[4,1,8,8], index: 4, kind: output, shape index: {2}]  }
   0x1   :  { %s716_s17 = smov 0  }
   0x2 LB: > { %s27_s18 = sadd.s32 1, %s681_s16  ;;  %p589_p0 = scmp.ge.s32.totalorder %s685_s17, 1  ;;  %s685_s17 = sphi %s716_s17, %s15_s17   ;;  %s681_s16 = sphi %s714_s16, %s779_s16   ;;  %s677_s15 = sphi %s712_s15, %s778_s15  }
   0x3   : > { %p29_p1 = scmp.ge.s32.totalorder %s27_s18, 4  ;;  %p202_p2 = scmp.lt.s32.totalorder %s685_s17, 5 }
   0x5   : > { %s781_s18 = smov (%p29_p1, %s27_s18), 0  ;;  %p203_p3 = pnand %p589_p0, %p202_p2 }
   0x6   : > { %p256_p4 = scmp.lt.s32.totalorder (!%p203_p3), %s677_s15, 3 }
   0x7   : > { %206 = sbr.rel (%p203_p3) target bundleno = 187 (0xbb), region = 28 }
   0xc   : > { %s783_s15 = smov (!%p256_p4, %s677_s15), 3  ;;  %vm341_vm0 = vcmask 523264   ;;  %vm367_vm1 = vcmask 64512  }
   0xd   : > { %s627_s19 = sshll.u32 %s783_s15, 5  ;;  %s626_s23 = sshll.u32 %s783_s15, 4 }
   0xe   : > { %s269_s22 = scalar_lea.vmem %s774_s1, %s627_s19  ;;  %s263_s26 = scalar_lea.vmem %s773_s0, %s626_s23 }
   0xf   : > { %v634_v0 = vld [vmem:[%s269_s22 + $0x18] sm:$0xff]  ;;  %v633_v1 = vld [vmem:[%s269_s22 + $0x10] sm:$0xff]  ;;  %v632_v2 = vld [vmem:[%s269_s22 + $0x8] sm:$0xff]  ;;  %s278_s29 = scalar_lea.vmem %s775_s2, %s627_s19  ;;  %s596_s30 = sshll.u32 %s783_s15, 3 }
  0x10   : > { %352 = vmatpush.bf16.msra.mxu0 %v634_v0  ;;  %635 = vmatpush.bf16.msra.mxu1 %v634_v0  ;;  %v631_v3 = vld [vmem:[%s269_s22] sm:$0xff]  ;;  %v630_v5 = vld [vmem:[%s263_s26 + $0x8] sm:$0xff]  ;;  %s286_s7 = scalar_lea.vmem %s776_s3, %s596_s30  ;;  %s293_s10 = scalar_lea.vmem %s777_s4, %s596_s30 }
  0x11   : > { %v629_v4 = vld [vmem:[%s263_s26] sm:$0xff] }
  0x14   : > { %353 = vmatpush.bf16.msra.mxu0 %v633_v1  ;;  %636 = vmatpush.bf16.msra.mxu1 %v633_v1 }
  0x18   : > { %354 = vmatpush.bf16.msra.mxu0 %v632_v2  ;;  %637 = vmatpush.bf16.msra.mxu1 %v632_v2 }
  0x1c   : > { %355 = vmatpush.bf16.msra.mxu0 %v631_v3  ;;  %638 = vmatpush.bf16.msra.mxu1 %v631_v3 }
  0x1f   : > { %622 = vmatmul.msk.bf16.vlgmr.msra.gmra.mxu0 %vm341_vm0, %v629_v4  ;;  %623 = vmatmul.msk.bf16.vlgmr.msra.gmra.mxu1 %vm341_vm0, %v630_v5 }
  0x9c   : > { %v357_v6 = vpop.f32.mrf.mxu0  ;;  %v362_v7 = vpop.f32.mrf.mxu1 }
  0x9d   : > { %368 = vst.msk [vmem:[%s278_s29] sm:$0xff] %vm367_vm1, %v357_v6  ;;  %v385_v8 = vmul.f32 %v357_v6, %v357_v6  ;;  %v372_v11 = vsel %vm367_vm1, %v357_v6, 0.0  ;;  %v387_v12 = vmul.f32 %v362_v7, %v362_v7  ;;  %v375_v17 = vsel %vm367_vm1, %v362_v7, 0.0 }
  0x9e   : > { %370 = vst.msk [vmem:[%s278_s29 + $0x10] sm:$0xff] %vm367_vm1, %v362_v7 }
  0x9f   : > { %v389_v16 = vsel %vm367_vm1, %v385_v8, 0.0  ;;  %v392_v22 = vsel %vm367_vm1, %v387_v12, 0.0 }
  0xa4   : > { %v359_v9 = vpop.f32.mrf.mxu0  ;;  %v364_v10 = vpop.f32.mrf.mxu1 }
  0xa5   : > { %369 = vst.msk [vmem:[%s278_s29 + $0x8] sm:$0xff] %vm367_vm1, %v359_v9  ;;  %v373_v13 = vsel %vm367_vm1, %v359_v9, 0.0  ;;  %v386_v14 = vmul.f32 %v359_v9, %v359_v9  ;;  %v388_v19 = vmul.f32 %v364_v10, %v364_v10  ;;  %v377_v23 = vsel %vm367_vm1, %v364_v10, 0.0 }
  0xa6   : > { %v374_v15 = vadd.f32 %v373_v13, %v372_v11  ;;  %371 = vst.msk [vmem:[%s278_s29 + $0x18] sm:$0xff] %vm367_vm1, %v364_v10 }
  0xa7   : > { %v390_v18 = vsel %vm367_vm1, %v386_v14, 0.0  ;;  %v394_v26 = vsel %vm367_vm1, %v388_v19, 0.0 }
  0xa8   : > { %v391_v20 = vadd.f32 %v390_v18, %v389_v16  ;;  %v376_v21 = vadd.f32 %v375_v17, %v374_v15 }
  0xaa   : > { %v378_v24 = vadd.f32 %v377_v23, %v376_v21  ;;  %v393_v25 = vadd.f32 %v392_v22, %v391_v20 }
  0xac   : > { %v379_v27 = vrot.slane %v378_v24, 4  ;;  %v395_v28 = vadd.f32 %v394_v26, %v393_v25 }
  0xae   : > { %v380_v29 = vadd.f32 %v379_v27, %v378_v24  ;;  %v396_v30 = vrot.slane %v395_v28, 4 }
  0xb0   : > { %v381_v31 = vrot.slane %v380_v29, 2  ;;  %v397_v32 = vadd.f32 %v396_v30, %v395_v28 }
  0xb2   : > { %v382_v33 = vadd.f32 %v381_v31, %v380_v29  ;;  %v398_v34 = vrot.slane %v397_v32, 2 }
  0xb4   : > { %v383_v35 = vrot.slane %v382_v33, 1  ;;  %v399_v36 = vadd.f32 %v398_v34, %v397_v32 }
  0xb6   : > { %v384_v37 = vadd.f32 %v383_v35, %v382_v33  ;;  %v400_v38 = vrot.slane %v399_v36, 1 }
  0xb8   : > { %v401_v39 = vadd.f32 %v400_v38, %v399_v36  ;;  %402 = vst.msk [vmem:[%s286_s7] sm:$0xff] %vm367_vm1, %v384_v37 }
  0xba   : > { %403 = vst.msk [vmem:[%s293_s10] sm:$0xff] %vm367_vm1, %v401_v39 }
  0xbb PF: > { %s15_s17 = sadd.s32 1, %s685_s17   ;;  %s778_s15 = smov %s681_s16 }
  0xbc   : > { %p12_p5 = scmp.ge.s32.totalorder %s15_s17, 6   ;;  %s779_s16 = smov %s781_s18 }
  0xbe   :  { %14 = sbr.rel (!%p12_p5) target bundleno = 2 (0x2), region = 85 }

// kernel: pxz_forward.8
= control target key start
LH: loop header
LB: loop body
LE: loop exit
PB: predicated region body
PF: predicated region fallthrough
CT: control target
= control target key end

     0   :  { %s357_s15 = smov 0   ;;  %s386_s0 = inlined_call_operand.vmem [shape: f32[128,8], index: 0, kind: input, shape index: {}]   ;;  %s387_s1 = inlined_call_operand.vmem [shape: f32[1,8], index: 1, kind: input, shape index: {}]   ;;  %s388_s2 = inlined_call_operand.vmem [shape: f32[1,8], index: 2, kind: input, shape index: {}]   ;;  %s389_s3 = inlined_call_operand.vmem [shape: f32[1,8], index: 3, kind: input, shape index: {}]   ;;  %s390_s4 = inlined_call_operand.vmem [shape: f32[128,8], index: 4, kind: output, shape index: {}]  }
   0x1 LB: > { %s302_s16 = sadd.s32 4294967295, %s330_s15   ;;  %p306_p0 = scmp.ge.s32.totalorder %s330_s15, 1  ;;  %s330_s15 = sphi %s357_s15, %s14_s15  }
   0x2   : > { %p163_p1 = scmp.lt.s32.totalorder %s330_s15, 5 }
   0x4   : > { %p164_p2 = pnand %p306_p0, %p163_p1 }
   0x5   : > { %s307_s17 = sshll.u32 (!%p164_p2), %s302_s16, 2 }
   0x6   : > { %167 = sbr.rel (%p164_p2) target bundleno = 29 (0x1d), region = 36  ;;  %p190_p3 = scmp.lt.s32.totalorder (!%p164_p2), %s307_s17, 15 }
   0xb   : > { %s392_s17 = smov (!%p190_p3, %s307_s17), 15  ;;  %v321_v0 = vld [vmem:[%s387_s1] ss:$0 sm:$0xff]  ;;  %vm241_vm0 = vcmask 64512  }
   0xc   : > { %s308_s20 = sshll.u32 %s392_s17, 3  ;;  %v322_v1 = vld [vmem:[%s388_s2] ss:$0 sm:$0xff] }
   0xd   : > { %s193_s23 = scalar_lea.vmem %s386_s0, %s308_s20  ;;  %v323_v11 = vld [vmem:[%s389_s3] ss:$0 sm:$0xff]  ;;  %s199_s30 = scalar_lea.vmem %s390_s4, %s308_s20 }
   0xe   : > { %v201_v2 = vld [vmem:[%s193_s23] sm:$0xff]  ;;  %v202_v3 = vld [vmem:[%s193_s23 + $0x8] sm:$0xff]  ;;  %v203_v4 = vld [vmem:[%s193_s23 + $0x10] sm:$0xff] }
   0xf   : > { %v204_v5 = vld [vmem:[%s193_s23 + $0x18] sm:$0xff]  ;;  %v209_v6 = vmul.f32 %v321_v0, %v201_v2  ;;  %v210_v7 = vmul.f32 %v321_v0, %v202_v3  ;;  %v211_v8 = vmul.f32 %v321_v0, %v203_v4 }
  0x10   : > { %v212_v9 = vmul.f32 %v321_v0, %v204_v5 }
  0x11   : > { %v217_v10 = vadd.f32 %v322_v1, %v209_v6  ;;  %v218_v12 = vadd.f32 %v322_v1, %v210_v7  ;;  %v219_v13 = vadd.f32 %v322_v1, %v211_v8 }
  0x12   : > { %v220_v14 = vadd.f32 %v322_v1, %v212_v9 }
  0x13   : > { %v221_v15 = vmax.f32 %v217_v10, 0.0  ;;  %v226_v16 = vmin.f32 %v217_v10, 0.0  ;;  %v222_v17 = vmax.f32 %v218_v12, 0.0  ;;  %v227_v18 = vmin.f32 %v218_v12, 0.0 }
  0x14   : > { %v223_v19 = vmax.f32 %v219_v13, 0.0  ;;  %v228_v20 = vmin.f32 %v219_v13, 0.0  ;;  %v224_v21 = vmax.f32 %v220_v14, 0.0  ;;  %v229_v22 = vmin.f32 %v220_v14, 0.0 }
  0x15   : > { %v233_v23 = vmul.f32 %v323_v11, %v226_v16  ;;  %v234_v24 = vmul.f32 %v323_v11, %v227_v18 }
  0x16   : > { %v235_v25 = vmul.f32 %v323_v11, %v228_v20  ;;  %v236_v26 = vmul.f32 %v323_v11, %v229_v22 }
  0x17   : > { %v237_v27 = vadd.f32 %v233_v23, %v221_v15  ;;  %v238_v28 = vadd.f32 %v234_v24, %v222_v17 }
  0x18   : > { %v239_v29 = vadd.f32 %v235_v25, %v223_v19  ;;  %v240_v30 = vadd.f32 %v236_v26, %v224_v21 }
  0x19   : > { %242 = vst.msk [vmem:[%s199_s30] sm:$0xff] %vm241_vm0, %v237_v27 }
  0x1a   : > { %243 = vst.msk [vmem:[%s199_s30 + $0x8] sm:$0xff] %vm241_vm0, %v238_v28 }
  0x1b   : > { %244 = vst.msk [vmem:[%s199_s30 + $0x10] sm:$0xff] %vm241_vm0, %v239_v29 }
  0x1c   : > { %245 = vst.msk [vmem:[%s199_s30 + $0x18] sm:$0xff] %vm241_vm0, %v240_v30 }
  0x1d PF: > { %s14_s15 = sadd.s32 1, %s330_s15  }
  0x1e   : > { %p11_p4 = scmp.ge.s32.totalorder %s14_s15, 6  }
  0x20   :  { %13 = sbr.rel (!%p11_p4) target bundleno = 1 (0x1), region = 66 }

// kernel: pxz_forward.9
= control target key start
LH: loop header
LB: loop body
LE: loop exit
PB: predicated region body
PF: predicated region fallthrough
CT: control target
= control target key end

     0   :  { %s992_s9 = smov 0   ;;  %s994_s10 = smov 0   ;;  %s1234_s0 = inlined_call_operand.vmem [shape: bf16[4,128,32], index: 0, kind: input, shape index: {}]   ;;  %s1235_s1 = inlined_call_operand.vmem [shape: bf16[4,32,128], index: 1, kind: input, shape index: {}]   ;;  %s1236_s2 = inlined_call_operand.vmem [shape: f32[4,128,128], index: 2, kind: output, shape index: {}]  }
   0x1   :  { %s996_s11 = smov 0  }
   0x2 LB: > { %s24_s12 = sadd.s32 1, %s971_s10  ;;  %p773_p0 = scmp.ge.s32.totalorder %s975_s11, 1  ;;  %s975_s11 = sphi %s996_s11, %s12_s11   ;;  %s971_s10 = sphi %s994_s10, %s1258_s10   ;;  %s967_s9 = sphi %s992_s9, %s1257_s9  }
   0x3   : > { %p26_p1 = scmp.ge.s32.totalorder %s24_s12, 4  ;;  %p143_p2 = scmp.lt.s32.totalorder %s975_s11, 5 }
   0x5   : > { %s1260_s12 = smov (%p26_p1, %s24_s12), 0  ;;  %p144_p3 = pnand %p773_p0, %p143_p2 }
   0x6   : > { %p179_p4 = scmp.lt.s32.totalorder (!%p144_p3), %s967_s9, 3 }
   0x7   : > { %147 = sbr.rel (%p144_p3) target bundleno = 232 (0xe8), region = 28 }
   0xc   : > { %s1262_s9 = smov (!%p179_p4, %s967_s9), 3  ;;  %vm276_vm0 = vcmask 261120  }
   0xd   : > { %s847_s13 = sshll.u32 %s1262_s9, 4  ;;  %s846_s14 = sshll.u32 %s1262_s9, 6 }
   0xe   : > { %s192_s17 = scalar_lea.vmem %s1235_s1, %s847_s13  ;;  %s186_s20 = scalar_lea.vmem %s1234_s0, %s846_s14 }
   0xf   : > { %v858_v0 = vld [vmem:[%s192_s17 + $0x8] sm:$0xff]  ;;  %v857_v1 = vld [vmem:[%s192_s17] sm:$0xff]  ;;  %v851_v3 = vld [vmem:[%s186_s20 + $0x10] sm:$0xff]  ;;  %s848_s21 = sshll.u32 %s1262_s9, 7 }
  0x10   : > { %307 = vmatpush.bf16.msra.mxu0 %v858_v0  ;;  %859 = vmatpush.bf16.msra.mxu1 %v858_v0  ;;  %v849_v2 = vld [vmem:[%s186_s20] sm:$0xff]  ;;  %v855_v5 = vld [vmem:[%s186_s20 + $0x30] sm:$0xff]  ;;  %v850_v6 = vld [vmem:[%s186_s20 + $0x8] sm:$0xff]  ;;  %s1052_s24 = scalar_lea.vmem %s1236_s2, %s848_s21 }
  0x11   : > { %860 = vmatpush.bf16.msra.mxu2 %v858_v0  ;;  %861 = vmatpush.bf16.msra.mxu3 %v858_v0  ;;  %v853_v4 = vld [vmem:[%s186_s20 + $0x20] sm:$0xff]  ;;  %v852_v7 = vld [vmem:[%s186_s20 + $0x18] sm:$0xff]  ;;  %v854_v8 = vld [vmem:[%s186_s20 + $0x28] sm:$0xff] }
  0x12   : > { %v856_v9 = vld [vmem:[%s186_s20 + $0x38] sm:$0xff] }
  0x14   : > { %308 = vmatpush.bf16.msra.mxu0 %v857_v1  ;;  %862 = vmatpush.bf16.msra.mxu1 %v857_v1 }
  0x15   : > { %863 = vmatpush.bf16.msra.mxu2 %v857_v1  ;;  %864 = vmatpush.bf16.msra.mxu3 %v857_v1 }
  0x17   : > { %820 = vmatmul.msk.bf16.vlgmr.msra.gmra.mxu0 %vm276_vm0, %v849_v2  ;;  %822 = vmatmul.msk.bf16.vlgmr.msra.gmra.mxu1 %vm276_vm0, %v851_v3 }
  0x18   : > { %824 = vmatmul.msk.bf16.vlgmr.msra.gmra.mxu2 %vm276_vm0, %v853_v4  ;;  %826 = vmatmul.msk.bf16.vlgmr.msra.gmra.mxu3 %vm276_vm0, %v855_v5 }
  0x27   : > { %821 = vmatmul.msk.bf16.gmra.mxu0 %vm276_vm0, %v850_v6  ;;  %823 = vmatmul.msk.bf16.gmra.mxu1 %vm276_vm0, %v852_v7 }
  0x28   : > { %825 = vmatmul.msk.bf16.gmra.mxu2 %vm276_vm0, %v854_v8  ;;  %827 = vmatmul.msk.bf16.gmra.mxu3 %vm276_vm0, %v856_v9 }
  0x94   : > { %v310_v10 = vpop.f32.mrf.mxu0  ;;  %v320_v11 = vpop.f32.mrf.mxu1 }
  0x95   : > { %v828_v12 = vmul.f32 -1.442695, %v310_v10  ;;  %v832_v13 = vmul.f32 -1.442695, %v320_v11 }
  0x97   : > { %889 = vpow2.f32 %v828_v12 }
  0x98   : > { %891 = vpow2.f32 %v832_v13 }
  0x9b   : > { %v330_v14 = vpop.f32.mrf.mxu2  ;;  %v340_v15 = vpop.f32.mrf.mxu3 }
  0x9c   : > { %v836_v16 = vmul.f32 -1.442695, %v330_v14  ;;  %v840_v17 = vmul.f32 -1.442695, %v340_v15  ;;  %v312_v18 = vpop.f32.mrf.mxu0  ;;  %v322_v19 = vpop.f32.mrf.mxu1 }
  0x9d   : > { %v890_v20 = vpop.eup %889  ;;  %v829_v23 = vmul.f32 -1.442695, %v312_v18  ;;  %v833_v25 = vmul.f32 -1.442695, %v322_v19 }
  0x9e   : > { %v892_v21 = vpop.eup %891  ;;  %v398_v22 = vadd.f32 1.0, %v890_v20  ;;  %893 = vpow2.f32 %v836_v16 }
  0x9f   : > { %v402_v24 = vadd.f32 1.0, %v892_v21  ;;  %895 = vpow2.f32 %v840_v17 }
  0xa0   : > { %897 = vrcp.f32 %v398_v22  ;;  %v423_v33 = vand.u32 2147483647, %v398_v22  ;;  %v425_v34 = vand.u32 2147483648, %v398_v22  ;;  %vm419_vm1 = vweird.f32 %v398_v22 }
  0xa1   : > { %899 = vrcp.f32 %v402_v24  ;;  %v483_v35 = vand.u32 2147483647, %v402_v24  ;;  %v485_v41 = vand.u32 2147483648, %v402_v24  ;;  %vm479_vm2 = vweird.f32 %v402_v24 }
  0xa2   : > { %901 = vpow2.f32 %v829_v23  ;;  %vm1034_vm3 = vcmp.eq.f32.partialorder %v423_v33, 8.507059e+37  ;;  %v426_v46 = vor.u32 1.1754944e-38, %v425_v34 }
  0xa3   : > { %903 = vpow2.f32 %v833_v25  ;;  %v332_v26 = vpop.f32.mrf.mxu2  ;;  %v342_v31 = vpop.f32.mrf.mxu3  ;;  %vm1038_vm4 = vcmp.eq.f32.partialorder %v483_v35, 8.507059e+37  ;;  %v486_v55 = vor.u32 1.1754944e-38, %v485_v41 }
  0xa4   : > { %v894_v27 = vpop.eup %893  ;;  %v837_v28 = vmul.f32 -1.442695, %v332_v26  ;;  %v841_v42 = vmul.f32 -1.442695, %v342_v31  ;;  %v315_v49 = vpop.f32.mrf.mxu0 }
  0xa5   : > { %v896_v29 = vpop.eup %895  ;;  %v1028_v30 = vadd.f32 1.0, %v894_v27  ;;  %v325_v53 = vpop.f32.mrf.mxu1  ;;  %v830_v59 = vmul.f32 -1.442695, %v315_v49 }
  0xa6   : > { %v898_v32 = vpop.eup %897  ;;  %v1030_v36 = vadd.f32 1.0, %v896_v29  ;;  %v1058_v63 = vmul.f32 -1.442695, %v325_v53 }
  0xa7   : > { %v900_v37 = vpop.eup %899  ;;  %v415_v38 = vmul.f32 %v898_v32, %v398_v22  ;;  %905 = vrcp.f32 %v1028_v30  ;;  %vm420_vm5 = vweird.f32 %v898_v32  ;;  %v543_v58 = vand.u32 2147483647, %v1028_v30 }
  0xa8   : > { %v902_v39 = vpop.eup %901  ;;  %v475_v40 = vmul.f32 %v900_v37, %v402_v24  ;;  %907 = vpow2.f32 %v837_v28  ;;  %vm480_vm6 = vweird.f32 %v900_v37  ;;  %vm421_vm7 = vmor %vm419_vm1, %vm420_vm5  ;;  %vm539_vm8 = vweird.f32 %v1028_v30 }
  0xa9   : > { %v904_v43 = vpop.eup %903  ;;  %v416_v44 = vsub.f32 1.0, %v415_v38  ;;  %909 = vrcp.f32 %v1030_v36  ;;  %v1043_v51 = vadd.f32 1.0, %v902_v39  ;;  %vm481_vm9 = vmor %vm479_vm2, %vm480_vm6  ;;  %v545_v2 = vand.u32 2147483648, %v1028_v30 }
  0xaa   : > { %v476_v47 = vsub.f32 1.0, %v475_v40  ;;  %v1045_v52 = vadd.f32 1.0, %v904_v43  ;;  %911 = vpow2.f32 %v841_v42  ;;  %v603_v3 = vand.u32 2147483647, %v1030_v36 }
  0xab   : > { %v417_v50 = vmul.f32 %v898_v32, %v416_v44  ;;  %913 = vrcp.f32 %v1043_v51  ;;  %vm1071_vm10 = vcmp.eq.f32.partialorder %v543_v58, 8.507059e+37  ;;  %vm599_vm11 = vweird.f32 %v1030_v36  ;;  %v335_v15 = vpop.f32.mrf.mxu2  ;;  %v345_v41 = vpop.f32.mrf.mxu3 }
  0xac   : > { %v477_v54 = vmul.f32 %v900_v37, %v476_v47  ;;  %915 = vrcp.f32 %v1045_v52  ;;  %v605_v10 = vand.u32 2147483648, %v1030_v36  ;;  %v546_v17 = vor.u32 1.1754944e-38, %v545_v2  ;;  %v317_v48 = vpop.f32.mrf.mxu0 }
  0xad   : > { %v906_v56 = vpop.eup %905  ;;  %v418_v57 = vadd.f32 %v898_v32, %v417_v50  ;;  %vm1080_vm14 = vcmp.eq.f32.partialorder %v603_v3, 8.507059e+37  ;;  %917 = vpow2.f32 %v830_v59  ;;  %v438_v25 = vand.u32 2147483647, %v1043_v51 }
  0xae   : > { %v908_v60 = vpop.eup %907  ;;  %v478_v61 = vadd.f32 %v900_v37, %v477_v54  ;;  %v535_v62 = vmul.f32 %v906_v56, %v1028_v30  ;;  %vm540_vm12 = vweird.f32 %v906_v56  ;;  %v606_v24 = vor.u32 1.1754944e-38, %v605_v10  ;;  %v327_v54 = vpop.f32.mrf.mxu1 }
  0xaf   : > { %v910_v0 = vpop.eup %909  ;;  %v422_v1 = vsel %vm421_vm7, %v898_v32, %v418_v57  ;;  %v1078_v14 = vadd.f32 1.0, %v908_v60  ;;  %vm541_vm15 = vmor %vm539_vm8, %vm540_vm12  ;;  %v838_v26 = vmul.f32 -1.442695, %v335_v15  ;;  %v440_v30 = vand.u32 2147483648, %v1043_v51 }
  0xb0   : > { %v427_v4 = vsel %vm1034_vm3, %v426_v46, %v422_v1  ;;  %v482_v5 = vsel %vm481_vm9, %v900_v37, %v478_v61  ;;  %v536_v6 = vsub.f32 1.0, %v535_v62  ;;  %v595_v7 = vmul.f32 %v910_v0, %v1030_v36  ;;  %v912_v11 = vpop.eup %911 }
  0xb1   : > { %654 = vst [vmem:[%s1052_s24] sm:$0xff] %v427_v4  ;;  %v487_v8 = vsel %vm1038_vm4, %v486_v55, %v482_v5  ;;  %v914_v16 = vpop.eup %913  ;;  %vm600_vm13 = vweird.f32 %v910_v0  ;;  %v1085_v22 = vadd.f32 1.0, %v912_v11  ;;  %919 = vrcp.f32 %v1078_v14 }
  0xb2   : > { %658 = vst [vmem:[%s1052_s24 + $0x20] sm:$0xff] %v487_v8  ;;  %v537_v12 = vmul.f32 %v906_v56, %v536_v6  ;;  %v596_v13 = vsub.f32 1.0, %v595_v7  ;;  %v430_v21 = vmul.f32 %v914_v16, %v1043_v51  ;;  %v916_v23 = vpop.eup %915  ;;  %vm601_vm0 = vmor %vm599_vm11, %vm600_vm13  ;;  %vm435_vm1 = vweird.f32 %v914_v16 }
  0xb3   : > { %v490_v31 = vmul.f32 %v916_v23, %v1045_v52  ;;  %v498_v33 = vand.u32 2147483647, %v1045_v52  ;;  %921 = vrcp.f32 %v1085_v22  ;;  %v918_v38 = vpop.eup %917  ;;  %vm434_vm2 = vweird.f32 %v1043_v51  ;;  %v337_v62 = vpop.f32.mrf.mxu2 }
  0xb4   : > { %v538_v19 = vadd.f32 %v906_v56, %v537_v12  ;;  %v597_v20 = vmul.f32 %v910_v0, %v596_v13  ;;  %v431_v29 = vsub.f32 1.0, %v430_v21  ;;  %vm1104_vm3 = vcmp.eq.f32.partialorder %v438_v25, 8.507059e+37  ;;  %vm436_vm5 = vmor %vm434_vm2, %vm435_vm1 }
  0xb5   : > { %v491_v37 = vsub.f32 1.0, %v490_v31  ;;  %v500_v40 = vand.u32 2147483648, %v1045_v52  ;;  %vm495_vm4 = vweird.f32 %v916_v23  ;;  %v1110_v44 = vadd.f32 1.0, %v918_v38 }
  0xb6   : > { %v542_v27 = vsel %vm541_vm15, %v906_v56, %v538_v19  ;;  %v598_v28 = vadd.f32 %v910_v0, %v597_v20  ;;  %v432_v35 = vmul.f32 %v914_v16, %v431_v29  ;;  %v441_v46 = vor.u32 1.1754944e-38, %v440_v30 }
  0xb7   : > { %v547_v32 = vsel %vm1071_vm10, %v546_v17, %v542_v27  ;;  %v492_v43 = vmul.f32 %v916_v23, %v491_v37  ;;  %v920_v45 = vpop.eup %919  ;;  %vm494_vm6 = vweird.f32 %v1045_v52  ;;  %vm1114_vm7 = vcmp.eq.f32.partialorder %v498_v33, 8.507059e+37 }
  0xb8   : > { %662 = vst [vmem:[%s1052_s24 + $0x40] sm:$0xff] %v547_v32  ;;  %v602_v34 = vsel %vm601_vm0, %v910_v0, %v598_v28  ;;  %v433_v42 = vadd.f32 %v914_v16, %v432_v35  ;;  %923 = vpow2.f32 %v1058_v63  ;;  %v550_v51 = vmul.f32 %v920_v45, %v1078_v14  ;;  %vm496_vm8 = vmor %vm494_vm6, %vm495_vm4 }
  0xb9   : > { %v607_v39 = vsel %vm1080_vm14, %v606_v24, %v602_v34  ;;  %v493_v50 = vadd.f32 %v916_v23, %v492_v43  ;;  %v842_v53 = vmul.f32 -1.442695, %v345_v41  ;;  %v501_v52 = vor.u32 1.1754944e-38, %v500_v40  ;;  %v922_v57 = vpop.eup %921 }
  0xba   : > { %666 = vst [vmem:[%s1052_s24 + $0x60] sm:$0xff] %v607_v39  ;;  %v437_v49 = vsel %vm436_vm5, %v914_v16, %v433_v42  ;;  %v558_v56 = vand.u32 2147483647, %v1078_v14  ;;  %925 = vrcp.f32 %v1110_v44  ;;  %v551_v59 = vsub.f32 1.0, %v550_v51 }
  0xbb   : > { %v442_v55 = vsel %vm1104_vm3, %v441_v46, %v437_v49  ;;  %v497_v58 = vsel %vm496_vm8, %v916_v23, %v493_v50  ;;  %v560_v60 = vand.u32 2147483648, %v1078_v14  ;;  %v831_v61 = vmul.f32 -1.442695, %v317_v48  ;;  %v347_v23 = vpop.f32.mrf.mxu3 }
  0xbc   : > { %655 = vst [vmem:[%s1052_s24 + $0x8] sm:$0xff] %v442_v55  ;;  %v502_v63 = vsel %vm1114_vm7, %v501_v52, %v497_v58  ;;  %v610_v0 = vmul.f32 %v922_v57, %v1085_v22  ;;  %927 = vpow2.f32 %v838_v26  ;;  %v835_v1 = vmul.f32 -1.442695, %v327_v54 }
  0xbd   : > { %659 = vst [vmem:[%s1052_s24 + $0x28] sm:$0xff] %v502_v63  ;;  %v552_v2 = vmul.f32 %v920_v45, %v551_v59  ;;  %vm554_vm9 = vweird.f32 %v1078_v14  ;;  %vm555_vm10 = vweird.f32 %v920_v45  ;;  %929 = vpow2.f32 %v842_v53 }
  0xbe   : > { %v924_v3 = vpop.eup %923  ;;  %vm1132_vm11 = vcmp.eq.f32.partialorder %v558_v56, 8.507059e+37  ;;  %v611_v5 = vsub.f32 1.0, %v610_v0  ;;  %v618_v6 = vand.u32 2147483647, %v1085_v22  ;;  %v839_v7 = vmul.f32 -1.442695, %v337_v62  ;;  %vm556_vm12 = vmor %vm554_vm9, %vm555_vm10 }
  0xbf   : > { %v553_v8 = vadd.f32 %v920_v45, %v552_v2  ;;  %v620_v9 = vand.u32 2147483648, %v1085_v22  ;;  %v1138_v10 = vadd.f32 1.0, %v924_v3  ;;  %931 = vpow2.f32 %v831_v61 }
  0xc0   : > { %v926_v11 = vpop.eup %925  ;;  %v561_v12 = vor.u32 1.1754944e-38, %v560_v60  ;;  %v612_v13 = vmul.f32 %v922_v57, %v611_v5  ;;  %vm615_vm13 = vweird.f32 %v922_v57  ;;  %933 = vpow2.f32 %v835_v1 }
  0xc1   : > { %v557_v14 = vsel %vm556_vm12, %v920_v45, %v553_v8  ;;  %vm614_vm14 = vweird.f32 %v1085_v22  ;;  %v445_v15 = vmul.f32 %v926_v11, %v1110_v44  ;;  %935 = vrcp.f32 %v1138_v10 }
  0xc2   : > { %v928_v16 = vpop.eup %927  ;;  %v562_v17 = vsel %vm1132_vm11, %v561_v12, %v557_v14  ;;  %v613_v18 = vadd.f32 %v922_v57, %v612_v13  ;;  %vm619_vm15 = vcmp.eq.f32.partialorder %v618_v6, 8.507059e+37  ;;  %937 = vpow2.f32 %v839_v7  ;;  %vm616_vm0 = vmor %vm614_vm14, %vm615_vm13 }
  0xc3   : > { %v930_v19 = vpop.eup %929  ;;  %663 = vst [vmem:[%s1052_s24 + $0x48] sm:$0xff] %v562_v17  ;;  %v621_v20 = vor.u32 1.1754944e-38, %v620_v9  ;;  %v446_v21 = vsub.f32 1.0, %v445_v15  ;;  %vm449_vm1 = vweird.f32 %v1110_v44  ;;  %v1147_v22 = vadd.f32 1.0, %v928_v16 }
  0xc4   : > { %v617_v24 = vsel %vm616_vm0, %v922_v57, %v613_v18  ;;  %v453_v25 = vand.u32 2147483647, %v1110_v44  ;;  %v455_v26 = vand.u32 2147483648, %v1110_v44  ;;  %v1151_v27 = vadd.f32 1.0, %v930_v19 }
  0xc5   : > { %v932_v28 = vpop.eup %931  ;;  %v622_v29 = vsel %vm619_vm15, %v621_v20, %v617_v24  ;;  %v447_v31 = vmul.f32 %v926_v11, %v446_v21  ;;  %vm450_vm2 = vweird.f32 %v926_v11  ;;  %939 = vrcp.f32 %v1147_v22 }
  0xc6   : > { %v934_v32 = vpop.eup %933  ;;  %667 = vst [vmem:[%s1052_s24 + $0x68] sm:$0xff] %v622_v29  ;;  %941 = vrcp.f32 %v1151_v27  ;;  %v843_v30 = vmul.f32 -1.442695, %v347_v23  ;;  %vm451_vm3 = vmor %vm449_vm1, %vm450_vm2  ;;  %vm454_vm4 = vcmp.eq.f32.partialorder %v453_v25, 8.507059e+37  ;;  %v456_v37 = vor.u32 1.1754944e-38, %v455_v26 }
  0xc7   : > { %v936_v33 = vpop.eup %935  ;;  %v448_v34 = vadd.f32 %v926_v11, %v447_v31  ;;  %v513_v36 = vand.u32 2147483647, %v1138_v10  ;;  %v515_v40 = vand.u32 2147483648, %v1138_v10  ;;  %v1161_v41 = vadd.f32 1.0, %v932_v28 }
  0xc8   : > { %v938_v35 = vpop.eup %937  ;;  %v505_v38 = vmul.f32 %v936_v33, %v1138_v10  ;;  %v1163_v45 = vadd.f32 1.0, %v934_v32  ;;  %943 = vpow2.f32 %v843_v30  ;;  %vm509_vm5 = vweird.f32 %v1138_v10 }
  0xc9   : > { %v452_v39 = vsel %vm451_vm3, %v926_v11, %v448_v34  ;;  %v573_v44 = vand.u32 2147483647, %v1147_v22  ;;  %945 = vrcp.f32 %v1161_v41  ;;  %v1169_v47 = vadd.f32 1.0, %v938_v35 }
  0xca   : > { %v457_v42 = vsel %vm454_vm4, %v456_v37, %v452_v39  ;;  %v506_v43 = vsub.f32 1.0, %v505_v38  ;;  %vm510_vm6 = vweird.f32 %v936_v33  ;;  %947 = vrcp.f32 %v1163_v45 }
  0xcb   : > { %v940_v46 = vpop.eup %939  ;;  %656 = vst [vmem:[%s1052_s24 + $0x10] sm:$0xff] %v457_v42  ;;  %vm1173_vm7 = vcmp.eq.f32.partialorder %v513_v36, 8.507059e+37  ;;  %v516_v53 = vor.u32 1.1754944e-38, %v515_v40  ;;  %v575_v54 = vand.u32 2147483648, %v1147_v22  ;;  %v633_v57 = vand.u32 2147483647, %v1151_v27  ;;  %vm511_vm8 = vmor %vm509_vm5, %vm510_vm6 }
  0xcc   : > { %v942_v48 = vpop.eup %941  ;;  %v507_v49 = vmul.f32 %v936_v33, %v506_v43  ;;  %v565_v50 = vmul.f32 %v940_v46, %v1147_v22  ;;  %v635_v58 = vand.u32 2147483648, %v1151_v27  ;;  %vm569_vm9 = vweird.f32 %v1147_v22 }
  0xcd   : > { %v625_v55 = vmul.f32 %v942_v48, %v1151_v27  ;;  %vm629_vm10 = vweird.f32 %v1151_v27  ;;  %949 = vrcp.f32 %v1169_v47  ;;  %vm570_vm11 = vweird.f32 %v940_v46 }
  0xce   : > { %v508_v52 = vadd.f32 %v936_v33, %v507_v49  ;;  %v566_v56 = vsub.f32 1.0, %v565_v50  ;;  %v944_v60 = vpop.eup %943  ;;  %vm1186_vm12 = vcmp.eq.f32.partialorder %v573_v44, 8.507059e+37  ;;  %v576_v2 = vor.u32 1.1754944e-38, %v575_v54  ;;  %vm571_vm15 = vmor %vm569_vm9, %vm570_vm11 }
  0xcf   : > { %v626_v59 = vsub.f32 1.0, %v625_v55  ;;  %v946_v0 = vpop.eup %945  ;;  %vm630_vm13 = vweird.f32 %v942_v48  ;;  %vm1193_vm14 = vcmp.eq.f32.partialorder %v633_v57, 8.507059e+37  ;;  %v636_v7 = vor.u32 1.1754944e-38, %v635_v58 }
  0xd0   : > { %v512_v61 = vsel %vm511_vm8, %v936_v33, %v508_v52  ;;  %v567_v62 = vmul.f32 %v940_v46, %v566_v56  ;;  %v948_v4 = vpop.eup %947  ;;  %v460_v8 = vmul.f32 %v946_v0, %v1161_v41  ;;  %vm464_vm0 = vweird.f32 %v1161_v41  ;;  %vm631_vm1 = vmor %vm629_vm10, %vm630_vm13 }
  0xd1   : > { %v517_v1 = vsel %vm1173_vm7, %v516_v53, %v512_v61  ;;  %v627_v3 = vmul.f32 %v942_v48, %v626_v59  ;;  %v468_v10 = vand.u32 2147483647, %v1161_v41  ;;  %v520_v11 = vmul.f32 %v948_v4, %v1163_v45 }
  0xd2   : > { %660 = vst [vmem:[%s1052_s24 + $0x30] sm:$0xff] %v517_v1  ;;  %v568_v5 = vadd.f32 %v940_v46, %v567_v62  ;;  %v461_v13 = vsub.f32 1.0, %v460_v8  ;;  %v470_v14 = vand.u32 2147483648, %v1161_v41  ;;  %v413_v15 = vadd.f32 1.0, %v944_v60 }
  0xd3   : > { %v628_v9 = vadd.f32 %v942_v48, %v627_v3  ;;  %v950_v16 = vpop.eup %949  ;;  %v521_v19 = vsub.f32 1.0, %v520_v11  ;;  %v530_v20 = vand.u32 2147483648, %v1163_v45  ;;  %vm465_vm2 = vweird.f32 %v946_v0 }
  0xd4   : > { %v572_v12 = vsel %vm571_vm15, %v940_v46, %v568_v5  ;;  %v462_v22 = vmul.f32 %v946_v0, %v461_v13  ;;  %v580_v23 = vmul.f32 %v950_v16, %v1169_v47  ;;  %vm525_vm3 = vweird.f32 %v948_v4  ;;  %vm466_vm5 = vmor %vm464_vm0, %vm465_vm2 }
  0xd5   : > { %v577_v17 = vsel %vm1186_vm12, %v576_v2, %v572_v12  ;;  %v632_v18 = vsel %vm631_vm1, %v942_v48, %v628_v9  ;;  %v522_v24 = vmul.f32 %v948_v4, %v521_v19  ;;  %v528_v25 = vand.u32 2147483647, %v1163_v45 }
  0xd6   : > { %664 = vst [vmem:[%s1052_s24 + $0x50] sm:$0xff] %v577_v17  ;;  %v637_v21 = vsel %vm1193_vm14, %v636_v7, %v632_v18  ;;  %951 = vrcp.f32 %v413_v15  ;;  %v463_v26 = vadd.f32 %v946_v0, %v462_v22  ;;  %vm469_vm4 = vcmp.eq.f32.partialorder %v468_v10, 8.507059e+37 }
  0xd7   : > { %668 = vst [vmem:[%s1052_s24 + $0x70] sm:$0xff] %v637_v21  ;;  %v471_v27 = vor.u32 1.1754944e-38, %v470_v14  ;;  %v581_v28 = vsub.f32 1.0, %v580_v23  ;;  %v523_v29 = vadd.f32 %v948_v4, %v522_v24  ;;  %vm524_vm6 = vweird.f32 %v1163_v45 }
  0xd8   : > { %v588_v31 = vand.u32 2147483647, %v1169_v47  ;;  %v590_v32 = vand.u32 2147483648, %v1169_v47  ;;  %v467_v30 = vsel %vm466_vm5, %v946_v0, %v463_v26  ;;  %vm526_vm7 = vmor %vm524_vm6, %vm525_vm3  ;;  %v531_v33 = vor.u32 1.1754944e-38, %v530_v20 }
  0xd9   : > { %v582_v34 = vmul.f32 %v950_v16, %v581_v28  ;;  %vm585_vm8 = vweird.f32 %v950_v16  ;;  %v472_v35 = vsel %vm469_vm4, %v471_v27, %v467_v30  ;;  %v527_v37 = vsel %vm526_vm7, %v948_v4, %v523_v29 }
  0xda   : > { %vm529_vm9 = vcmp.eq.f32.partialorder %v528_v25, 8.507059e+37  ;;  %657 = vst [vmem:[%s1052_s24 + $0x18] sm:$0xff] %v472_v35  ;;  %vm584_vm10 = vweird.f32 %v1169_v47  ;;  %v591_v40 = vor.u32 1.1754944e-38, %v590_v32  ;;  %vm589_vm12 = vcmp.eq.f32.partialorder %v588_v31, 8.507059e+37 }
  0xdb   : > { %v532_v38 = vsel %vm529_vm9, %v531_v33, %v527_v37  ;;  %v583_v39 = vadd.f32 %v950_v16, %v582_v34  ;;  %vm586_vm11 = vmor %vm584_vm10, %vm585_vm8  ;;  %v650_v46 = vand.u32 2147483648, %v413_v15  ;;  %v648_v48 = vand.u32 2147483647, %v413_v15 }
  0xdc   : > { %v952_v36 = vpop.eup %951  ;;  %661 = vst [vmem:[%s1052_s24 + $0x38] sm:$0xff] %v532_v38  ;;  %vm644_vm14 = vweird.f32 %v413_v15 }
  0xdd   : > { %v587_v41 = vsel %vm586_vm11, %v950_v16, %v583_v39  ;;  %v640_v42 = vmul.f32 %v952_v36, %v413_v15  ;;  %vm645_vm13 = vweird.f32 %v952_v36  ;;  %v651_v50 = vor.u32 1.1754944e-38, %v650_v46 }
  0xde   : > { %v592_v43 = vsel %vm589_vm12, %v591_v40, %v587_v41  ;;  %vm646_vm15 = vmor %vm644_vm14, %vm645_vm13  ;;  %vm649_vm0 = vcmp.eq.f32.partialorder %v648_v48, 8.507059e+37 }
  0xdf   : > { %665 = vst [vmem:[%s1052_s24 + $0x58] sm:$0xff] %v592_v43  ;;  %v641_v45 = vsub.f32 1.0, %v640_v42 }
  0xe1   : > { %v642_v44 = vmul.f32 %v952_v36, %v641_v45 }
  0xe3   : > { %v643_v49 = vadd.f32 %v952_v36, %v642_v44 }
  0xe5   : > { %v647_v47 = vsel %vm646_vm15, %v952_v36, %v643_v49 }
  0xe6   : > { %v652_v51 = vsel %vm649_vm0, %v651_v50, %v647_v47 }
  0xe7   : > { %669 = vst [vmem:[%s1052_s24 + $0x78] sm:$0xff] %v652_v51 }
  0xe8 PF: > { %s12_s11 = sadd.s32 1, %s975_s11   ;;  %s1257_s9 = smov %s971_s10 }
  0xe9   : > { %p9_p5 = scmp.ge.s32.totalorder %s12_s11, 6   ;;  %s1258_s10 = smov %s1260_s12 }
  0xeb   :  { %11 = sbr.rel (!%p9_p5) target bundleno = 2 (0x2), region = 61 }

</bundles_post_ra>
